<compile_context>
chip_gen: v5e
topology: v5e:2x2
jax: 0.10.0
libtpu: 0.0.40
codegen_flags: <defaults>
</compile_context>

<pallas_src>
import functools
import math

import jax
import jax.numpy as jnp
from jax.experimental import pallas as pl
from jax.experimental.pallas import tpu as pltpu


# ----------------------------------------------------------------------------
# helpers
# ----------------------------------------------------------------------------
def _pick_tile(m, cap=512):
    """Largest power-of-two row tile <= cap that divides m (else one block)."""
    t = cap
    while t >= 8:
        if m % t == 0:
            return t
        t //= 2
    return m


# ----------------------------------------------------------------------------
# Kernel 1: valid 2x2 / stride-1 convolution (the single spatial primitive).
# Grid walks (batch, output row); two BlockSpecs onto the same NHWC input give
# rows i and i+1; the four taps are four MXU GEMMs accumulated in f32 with
# fused bias + optional ReLU.
# ----------------------------------------------------------------------------
def _conv2x2_kernel(top_ref, bot_ref, w_ref, b_ref, o_ref, *, relu, wo):
    f32 = jnp.float32
    acc = jnp.dot(top_ref[0, 0, 0:wo, :], w_ref[0], preferred_element_type=f32)
    acc = acc + jnp.dot(top_ref[0, 0, 1:wo + 1, :], w_ref[1],
                        preferred_element_type=f32)
    acc = acc + jnp.dot(bot_ref[0, 0, 0:wo, :], w_ref[2],
                        preferred_element_type=f32)
    acc = acc + jnp.dot(bot_ref[0, 0, 1:wo + 1, :], w_ref[3],
                        preferred_element_type=f32)
    acc = acc + b_ref[...]
    if relu:
        acc = jnp.maximum(acc, 0.0)
    o_ref[0, 0] = acc.astype(o_ref.dtype)


def conv2x2(y, w4, b, *, relu, out_dtype=jnp.bfloat16):
    """y: (B, Hy, Wy, C) NHWC; w4: (4, C, N) taps ordered 2*di+dj; b: (N,)."""
    B, Hy, Wy, C = y.shape
    N = w4.shape[-1]
    Ho, Wo = Hy - 1, Wy - 1

    ybf = y.astype(jnp.bfloat16)
    wbf = w4.astype(jnp.bfloat16)
    b2d = b.reshape(1, N).astype(jnp.float32)

    return pl.pallas_call(
        functools.partial(_conv2x2_kernel, relu=relu, wo=Wo),
        out_shape=jax.ShapeDtypeStruct((B, Ho, Wo, N), out_dtype),
        grid_spec=pltpu.PrefetchScalarGridSpec(
            num_scalar_prefetch=0,
            grid=(B, Ho),
            in_specs=[
                pl.BlockSpec((1, 1, Wy, C), lambda b_, i: (b_, i, 0, 0)),
                pl.BlockSpec((1, 1, Wy, C), lambda b_, i: (b_, i + 1, 0, 0)),
                pl.BlockSpec((4, C, N), lambda b_, i: (0, 0, 0)),
                pl.BlockSpec((1, N), lambda b_, i: (0, 0)),
            ],
            out_specs=pl.BlockSpec((1, 1, Wo, N), lambda b_, i: (b_, i, 0, 0)),
        ),
        compiler_params=pltpu.CompilerParams(
            dimension_semantics=("parallel", "parallel")),
        cost_estimate=pl.CostEstimate(
            flops=2 * B * Ho * Wo * 4 * C * N,
            transcendentals=0,
            bytes_accessed=2 * B * Hy * Wy * C * 2 + 4 * C * N * 2
                           + B * Ho * Wo * N * 2),
    )(ybf, ybf, wbf, b2d)


# ----------------------------------------------------------------------------
# Kernel 2: row-tiled GEMM + bias (+ReLU) for 1x1 convolutions (NHWC flattened).
# ----------------------------------------------------------------------------
def _gemm_bias_kernel(a_ref, w_ref, b_ref, o_ref, *, relu):
    acc = jnp.dot(a_ref[...], w_ref[...], preferred_element_type=jnp.float32)
    acc = acc + b_ref[...]
    if relu:
        acc = jnp.maximum(acc, 0.0)
    o_ref[...] = acc.astype(o_ref.dtype)


def gemm_bias(a, w, b, *, relu=False, out_dtype=jnp.bfloat16, tm_cap=512):
    M, K = a.shape
    N = w.shape[1]
    tm = _pick_tile(M, tm_cap)
    return pl.pallas_call(
        functools.partial(_gemm_bias_kernel, relu=relu),
        out_shape=jax.ShapeDtypeStruct((M, N), out_dtype),
        grid_spec=pltpu.PrefetchScalarGridSpec(
            num_scalar_prefetch=0,
            grid=(M // tm,),
            in_specs=[
                pl.BlockSpec((tm, K), lambda i: (i, 0)),
                pl.BlockSpec((K, N), lambda i: (0, 0)),
                pl.BlockSpec((1, N), lambda i: (0, 0)),
            ],
            out_specs=pl.BlockSpec((tm, N), lambda i: (i, 0)),
        ),
        compiler_params=pltpu.CompilerParams(dimension_semantics=("parallel",)),
        cost_estimate=pl.CostEstimate(
            flops=2 * M * K * N, transcendentals=0,
            bytes_accessed=M * K * 2 + K * N * 2 + M * N * 4),
    )(a.astype(jnp.bfloat16), w.astype(jnp.bfloat16),
      b.reshape(1, N).astype(jnp.float32))


# ----------------------------------------------------------------------------
# Kernel 3: fused encoder head
#   1x1 conv (hdim -> num_tokens) + gumbel-softmax over the token axis
#   + codebook matmul (num_tokens -> dim).
# ----------------------------------------------------------------------------
def _enc_head_kernel(h_ref, w_ref, b_ref, g_ref, cb_ref, o_ref, *, inv_tau):
    logits = jnp.dot(h_ref[...], w_ref[...], preferred_element_type=jnp.float32)
    logits = logits + b_ref[...]
    y = (logits + g_ref[...]) * inv_tau
    m = jnp.max(y, axis=-1, keepdims=True)
    e = jnp.exp(y - m)
    s = jnp.sum(e, axis=-1, keepdims=True)
    p = e * pl.reciprocal(s, approx=True)          # softmax over num_tokens
    o_ref[...] = jnp.dot(p.astype(cb_ref.dtype), cb_ref[...],
                         preferred_element_type=jnp.float32).astype(o_ref.dtype)


def encoder_head(h2d, w, b, gumbel, codebook, *, tau=1.0, tm_cap=256):
    M, K = h2d.shape
    T = w.shape[1]
    D = codebook.shape[1]
    tm = _pick_tile(M, tm_cap)
    # TODO(synk): for very large num_tokens/dim the resident (K,T)/(T,D) weight
    # blocks should get K/N grid tiling with a VMEM accumulator (v7x 64 MiB).
    return pl.pallas_call(
        functools.partial(_enc_head_kernel, inv_tau=1.0 / tau),
        out_shape=jax.ShapeDtypeStruct((M, D), jnp.bfloat16),
        grid_spec=pltpu.PrefetchScalarGridSpec(
            num_scalar_prefetch=0,
            grid=(M // tm,),
            in_specs=[
                pl.BlockSpec((tm, K), lambda i: (i, 0)),
                pl.BlockSpec((K, T), lambda i: (0, 0)),
                pl.BlockSpec((1, T), lambda i: (0, 0)),
                pl.BlockSpec((tm, T), lambda i: (i, 0)),
                pl.BlockSpec((T, D), lambda i: (0, 0)),
            ],
            out_specs=pl.BlockSpec((tm, D), lambda i: (i, 0)),
        ),
        compiler_params=pltpu.CompilerParams(dimension_semantics=("parallel",)),
        cost_estimate=pl.CostEstimate(
            flops=2 * M * K * T + 2 * M * T * D,
            transcendentals=M * T,
            bytes_accessed=M * K * 2 + K * T * 2 + M * T * 4 + T * D * 2
                           + M * D * 2),
    )(h2d.astype(jnp.bfloat16), w.astype(jnp.bfloat16),
      b.reshape(1, T).astype(jnp.float32), gumbel.astype(jnp.float32),
      codebook.astype(jnp.bfloat16))


# ----------------------------------------------------------------------------
# Layer wrappers (layout-only JAX glue; all FLOPs run in the kernels above).
# ----------------------------------------------------------------------------
def conv4x4_s2(x, w, b, *, relu):
    """PyTorch Conv2d(k=4, stride=2, padding=1) on NHWC input.

    pad(1) + space-to-depth(2) turns it into a valid 2x2/stride-1 conv, so the
    kernel never sees strided accesses and no im2col is materialised.
    """
    B, H, W, Cin = x.shape
    Cout = w.shape[0]
    assert H % 2 == 0 and W % 2 == 0
    xp = jnp.pad(x, ((0, 0), (1, 1), (1, 1), (0, 0)))
    Hp, Wp = H + 2, W + 2
    y = xp.reshape(B, Hp // 2, 2, Wp // 2, 2, Cin)
    y = y.transpose(0, 1, 3, 2, 4, 5).reshape(B, Hp // 2, Wp // 2, 4 * Cin)
    # W2[(bi,bj), (si,sj,ci), co] = w[co, ci, 2*bi+si, 2*bj+sj]
    w6 = w.reshape(Cout, Cin, 2, 2, 2, 2)             # (co, ci, bi, si, bj, sj)
    w4 = w6.transpose(2, 4, 3, 5, 1, 0).reshape(4, 4 * Cin, Cout)
    return conv2x2(y, w4, b, relu=relu)


def deconv4x4_s2(x, w, b, *, relu):
    """PyTorch ConvTranspose2d(k=4, stride=2, padding=1) on NHWC input.

    Sub-pixel formulation: one valid 2x2/stride-1 conv over the 1-padded input
    producing 4*Cout phase channels (no multiplies by structural zeros), then a
    depth-to-space interleave of the four phases.
    """
    B, Hin, Win, Cin = x.shape
    Cout = w.shape[1]
    xp = jnp.pad(x, ((0, 0), (1, 1), (1, 1), (0, 0)))
    # W2[(di,dj), ci, (r,c,co)] = w[ci, co, 3-r-2*di, 3-c-2*dj]
    taps = []
    for di in range(2):
        for dj in range(2):
            phases = []
            for r in range(2):
                for c in range(2):
                    phases.append(w[:, :, 3 - r - 2 * di, 3 - c - 2 * dj])
            ph = jnp.stack(phases, axis=0)                      # (4, Cin, Cout)
            ph = ph.transpose(1, 0, 2).reshape(Cin, 4 * Cout)   # (ci, (r,c,co))
            taps.append(ph)
    w4 = jnp.stack(taps, axis=0)                                # (4, Cin, 4*Cout)
    b4 = jnp.tile(b, 4)

    z = conv2x2(xp, w4, b4, relu=relu)            # (B, Hin+1, Win+1, 4*Cout)
    z = z.reshape(B, Hin + 1, Win + 1, 2, 2, Cout)
    # out[b, 2i+r, 2j+c, :] = z[b, i+r, j+c, r, c, :]
    p00 = z[:, 0:Hin, 0:Win, 0, 0, :]
    p01 = z[:, 0:Hin, 1:Win + 1, 0, 1, :]
    p10 = z[:, 1:Hin + 1, 0:Win, 1, 0, :]
    p11 = z[:, 1:Hin + 1, 1:Win + 1, 1, 1, :]
    row0 = jnp.stack([p00, p01], axis=3)          # (B, Hin, Win, 2, Cout)
    row1 = jnp.stack([p10, p11], axis=3)
    out = jnp.stack([row0, row1], axis=2)         # (B, Hin, 2, Win, 2, Cout)
    return out.reshape(B, 2 * Hin, 2 * Win, Cout)


# ----------------------------------------------------------------------------
# DiscreteVAE parameters + forward
# ----------------------------------------------------------------------------
def init_params(key, num_tokens, dim, hdim):
    """Deterministic synthetic parameters (PyTorch-like uniform init)."""
    keys = jax.random.split(key, 20)
    p = {}

    def conv_init(kw_, kb_, cout, cin, k):
        fan_in = cin * k * k
        bound = 1.0 / math.sqrt(fan_in)
        w = jax.random.uniform(kw_, (cout, cin, k, k), jnp.float32, -bound, bound)
        b = jax.random.uniform(kb_, (cout,), jnp.float32, -bound, bound)
        return w, b

    def deconv_init(kw_, kb_, cin, cout, k):
        fan_in = cin * k * k
        bound = 1.0 / math.sqrt(fan_in)
        w = jax.random.uniform(kw_, (cin, cout, k, k), jnp.float32, -bound, bound)
        b = jax.random.uniform(kb_, (cout,), jnp.float32, -bound, bound)
        return w, b

    p['enc_w1'], p['enc_b1'] = conv_init(keys[0], keys[1], hdim, 3, 4)
    p['enc_w2'], p['enc_b2'] = conv_init(keys[2], keys[3], hdim, hdim, 4)
    p['enc_w3'], p['enc_b3'] = conv_init(keys[4], keys[5], hdim, hdim, 4)
    p['enc_w4'], p['enc_b4'] = conv_init(keys[6], keys[7], num_tokens, hdim, 1)

    p['dec_w1'], p['dec_b1'] = deconv_init(keys[8], keys[9], dim, hdim, 4)
    p['dec_w2'], p['dec_b2'] = deconv_init(keys[10], keys[11], hdim, hdim, 4)
    p['dec_w3'], p['dec_b3'] = deconv_init(keys[12], keys[13], hdim, hdim, 4)
    p['dec_w4'], p['dec_b4'] = conv_init(keys[14], keys[15], 3, hdim, 1)

    # nn.Embedding default init: N(0, 1)
    p['codebook'] = jax.random.normal(keys[16], (num_tokens, dim), jnp.float32)
    return p


def discrete_vae_forward(params, img, gumbel_key, tau=1.0):
    """DiscreteVAE.forward(img) with default flags (returns the reconstruction)."""
    # single NCHW -> NHWC transpose; activations stay NHWC / bf16 from here on
    x = img.astype(jnp.bfloat16).transpose(0, 2, 3, 1)

    # ---- encoder -----------------------------------------------------------
    h = conv4x4_s2(x, params['enc_w1'], params['enc_b1'], relu=True)
    h = conv4x4_s2(h, params['enc_w2'], params['enc_b2'], relu=True)
    h = conv4x4_s2(h, params['enc_w3'], params['enc_b3'], relu=True)

    # ---- fused: 1x1 conv -> gumbel-softmax over tokens -> codebook matmul ---
    # (softmax runs over the num_tokens axis that the codebook einsum
    #  contracts, i.e. dalle_pytorch's dim=1, which is also the lane axis)
    B, He, We, hd = h.shape
    num_tokens, dim = params['codebook'].shape
    M = B * He * We
    gumbel = jax.random.gumbel(gumbel_key, (M, num_tokens), dtype=jnp.float32)
    w_logits = params['enc_w4'].reshape(num_tokens, hd).T          # (hdim, T)
    sampled = encoder_head(h.reshape(M, hd), w_logits, params['enc_b4'],
                           gumbel, params['codebook'], tau=tau)
    sampled = sampled.reshape(B, He, We, dim)

    # ---- decoder ------------------------------------------------------------
    d = deconv4x4_s2(sampled, params['dec_w1'], params['dec_b1'], relu=True)
    d = deconv4x4_s2(d, params['dec_w2'], params['dec_b2'], relu=True)
    d = deconv4x4_s2(d, params['dec_w3'], params['dec_b3'], relu=True)

    Bo, Ho, Wo, _ = d.shape
    w_out = params['dec_w4'].reshape(3, hd).T                      # (hdim, 3)
    out = gemm_bias(d.reshape(Bo * Ho * Wo, hd), w_out, params['dec_b4'],
                    relu=False, out_dtype=jnp.float32)
    out = out.reshape(Bo, Ho, Wo, 3).transpose(0, 3, 1, 2)         # back to NCHW
    return out


# ----------------------------------------------------------------------------
if __name__ == "__main__":
    # small-but-consistent shapes: 3 stride-2 convs need spatial % 8 == 0
    B, IMG, NUM_TOKENS, DIM, HDIM = 2, 32, 16, 32, 16

    root = jax.random.PRNGKey(0)
    k_img, k_params, k_gumbel = jax.random.split(root, 3)

    img = jax.random.normal(k_img, (B, 3, IMG, IMG), jnp.float32)
    params = init_params(k_params, NUM_TOKENS, DIM, HDIM)

    fwd = jax.jit(functools.partial(discrete_vae_forward, tau=1.0))
    out = fwd(params, img, k_gumbel)
    out = jax.block_until_ready(out)

    assert out.shape == (B, 3, IMG, IMG), out.shape
    assert jnp.all(jnp.isfinite(out)), "non-finite output"
    print("KERNEL_OK")
</pallas_src>

<mosaic_0001>
module attributes {stable_mosaic.version = 11 : i64} {
  func.func @_conv2x2_kernel(%arg0: i32, %arg1: i32, %arg2: memref<1x1x17x12xbf16, #tpu.memory_space<vmem>>, %arg3: memref<1x1x17x12xbf16, #tpu.memory_space<vmem>>, %arg4: memref<4x12x16xbf16, #tpu.memory_space<vmem>>, %arg5: memref<1x16xf32, #tpu.memory_space<vmem>>, %arg6: memref<1x1x16x16xbf16, #tpu.memory_space<vmem>>) attributes {dimension_semantics = [#tpu.dimension_semantics<parallel>, #tpu.dimension_semantics<parallel>], iteration_bounds = array<i64: 2, 16>, scalar_prefetch = 0 : i64, scratch_operands = 0 : i64, tpu.core_type = #tpu.core_type<tc>, window_params = [{transform_indices = @transform_0, window_bounds = array<i64: 1, 1, 17, 12>}, {transform_indices = @transform_1, window_bounds = array<i64: 1, 1, 17, 12>}, {pipeline_mode = #tpu.pipeline_mode<synchronous>, transform_indices = @transform_2, window_bounds = array<i64: 4, 12, 16>}, {pipeline_mode = #tpu.pipeline_mode<synchronous>, transform_indices = @transform_3, window_bounds = array<i64: 1, 16>}, {transform_indices = @transform_4, window_bounds = array<i64: 1, 1, 16, 16>}]} {
    %c0 = arith.constant 0 : index
    %c0_0 = arith.constant 0 : index
    %c0_1 = arith.constant 0 : index
    %c0_2 = arith.constant 0 : index
    %0 = vector.load %arg2[%c0, %c0_0, %c0_1, %c0_2] : memref<1x1x17x12xbf16, #tpu.memory_space<vmem>>, vector<1x1x16x12xbf16>
    %1 = vector.shape_cast %0 : vector<1x1x16x12xbf16> to vector<16x12xbf16>
    %c0_3 = arith.constant 0 : index
    %c0_4 = arith.constant 0 : index
    %c0_5 = arith.constant 0 : index
    %2 = vector.load %arg4[%c0_3, %c0_4, %c0_5] : memref<4x12x16xbf16, #tpu.memory_space<vmem>>, vector<1x12x16xbf16>
    %3 = vector.shape_cast %2 : vector<1x12x16xbf16> to vector<12x16xbf16>
    %cst = arith.constant dense<0.000000e+00> : vector<16x16xf32>
    %4 = tpu.matmul %1, %3, %cst {dimension_numbers = #tpu.dot_dimension_numbers<[1], [0], [0], [1], [0, 0, 1, 1], [], []>} : vector<16x12xbf16>, vector<12x16xbf16>, vector<16x16xf32> -> vector<16x16xf32>
    %c0_6 = arith.constant 0 : index
    %c0_7 = arith.constant 0 : index
    %c1 = arith.constant 1 : index
    %c0_8 = arith.constant 0 : index
    %5 = vector.load %arg2[%c0_6, %c0_7, %c1, %c0_8] : memref<1x1x17x12xbf16, #tpu.memory_space<vmem>>, vector<1x1x16x12xbf16>
    %6 = vector.shape_cast %5 : vector<1x1x16x12xbf16> to vector<16x12xbf16>
    %c1_9 = arith.constant 1 : index
    %c0_10 = arith.constant 0 : index
    %c0_11 = arith.constant 0 : index
    %7 = vector.load %arg4[%c1_9, %c0_10, %c0_11] : memref<4x12x16xbf16, #tpu.memory_space<vmem>>, vector<1x12x16xbf16>
    %8 = vector.shape_cast %7 : vector<1x12x16xbf16> to vector<12x16xbf16>
    %cst_12 = arith.constant dense<0.000000e+00> : vector<16x16xf32>
    %9 = tpu.matmul %6, %8, %cst_12 {dimension_numbers = #tpu.dot_dimension_numbers<[1], [0], [0], [1], [0, 0, 1, 1], [], []>} : vector<16x12xbf16>, vector<12x16xbf16>, vector<16x16xf32> -> vector<16x16xf32>
    %10 = arith.addf %4, %9 : vector<16x16xf32>
    %c0_13 = arith.constant 0 : index
    %c0_14 = arith.constant 0 : index
    %c0_15 = arith.constant 0 : index
    %c0_16 = arith.constant 0 : index
    %11 = vector.load %arg3[%c0_13, %c0_14, %c0_15, %c0_16] : memref<1x1x17x12xbf16, #tpu.memory_space<vmem>>, vector<1x1x16x12xbf16>
    %12 = vector.shape_cast %11 : vector<1x1x16x12xbf16> to vector<16x12xbf16>
    %c2 = arith.constant 2 : index
    %c0_17 = arith.constant 0 : index
    %c0_18 = arith.constant 0 : index
    %13 = vector.load %arg4[%c2, %c0_17, %c0_18] : memref<4x12x16xbf16, #tpu.memory_space<vmem>>, vector<1x12x16xbf16>
    %14 = vector.shape_cast %13 : vector<1x12x16xbf16> to vector<12x16xbf16>
    %cst_19 = arith.constant dense<0.000000e+00> : vector<16x16xf32>
    %15 = tpu.matmul %12, %14, %cst_19 {dimension_numbers = #tpu.dot_dimension_numbers<[1], [0], [0], [1], [0, 0, 1, 1], [], []>} : vector<16x12xbf16>, vector<12x16xbf16>, vector<16x16xf32> -> vector<16x16xf32>
    %16 = arith.addf %10, %15 : vector<16x16xf32>
    %c0_20 = arith.constant 0 : index
    %c0_21 = arith.constant 0 : index
    %c1_22 = arith.constant 1 : index
    %c0_23 = arith.constant 0 : index
    %17 = vector.load %arg3[%c0_20, %c0_21, %c1_22, %c0_23] : memref<1x1x17x12xbf16, #tpu.memory_space<vmem>>, vector<1x1x16x12xbf16>
    %18 = vector.shape_cast %17 : vector<1x1x16x12xbf16> to vector<16x12xbf16>
    %c3 = arith.constant 3 : index
    %c0_24 = arith.constant 0 : index
    %c0_25 = arith.constant 0 : index
    %19 = vector.load %arg4[%c3, %c0_24, %c0_25] : memref<4x12x16xbf16, #tpu.memory_space<vmem>>, vector<1x12x16xbf16>
    %20 = vector.shape_cast %19 : vector<1x12x16xbf16> to vector<12x16xbf16>
    %cst_26 = arith.constant dense<0.000000e+00> : vector<16x16xf32>
    %21 = tpu.matmul %18, %20, %cst_26 {dimension_numbers = #tpu.dot_dimension_numbers<[1], [0], [0], [1], [0, 0, 1, 1], [], []>} : vector<16x12xbf16>, vector<12x16xbf16>, vector<16x16xf32> -> vector<16x16xf32>
    %22 = arith.addf %16, %21 : vector<16x16xf32>
    %c0_27 = arith.constant 0 : index
    %c0_28 = arith.constant 0 : index
    %23 = vector.load %arg5[%c0_27, %c0_28] : memref<1x16xf32, #tpu.memory_space<vmem>>, vector<1x16xf32>
    %24 = vector.broadcast %23 : vector<1x16xf32> to vector<16x16xf32>
    %25 = arith.addf %22, %24 : vector<16x16xf32>
    %cst_29 = arith.constant 0.000000e+00 : f32
    %26 = vector.broadcast %cst_29 : f32 to vector<16x16xf32>
    %27 = arith.maximumf %25, %26 : vector<16x16xf32>
    %28 = arith.truncf %27 : vector<16x16xf32> to vector<16x16xbf16>
    %c0_30 = arith.constant 0 : index
    %c0_31 = arith.constant 0 : index
    %c0_32 = arith.constant 0 : index
    %c0_33 = arith.constant 0 : index
    %29 = vector.load %arg6[%c0_30, %c0_31, %c0_32, %c0_33] : memref<1x1x16x16xbf16, #tpu.memory_space<vmem>>, vector<1x1x16x16xbf16>
    %30 = vector.shape_cast %29 : vector<1x1x16x16xbf16> to vector<16x16xbf16>
    %31 = vector.shape_cast %28 : vector<16x16xbf16> to vector<1x1x16x16xbf16>
    tpu.vector_store %arg6[%c0_30, %c0_31, %c0_32, %c0_33], %31 {strides = array<i32>} : memref<1x1x16x16xbf16, #tpu.memory_space<vmem>>, vector<1x1x16x16xbf16>,
    return
  }
  func.func @transform_0(%arg0: i32, %arg1: i32) -> (i32, i32, i32, i32) {
    %c0_i32 = arith.constant 0 : i32
    %c0_i32_0 = arith.constant 0 : i32
    %c0_i32_1 = arith.constant 0 : i32
    return %arg0, %arg1, %c0_i32, %c0_i32_0 : i32, i32, i32, i32
  }
  func.func @transform_1(%arg0: i32, %arg1: i32) -> (i32, i32, i32, i32) {
    %c1_i32 = arith.constant 1 : i32
    %0 = arith.addi %arg1, %c1_i32 : i32
    %c0_i32 = arith.constant 0 : i32
    %c0_i32_0 = arith.constant 0 : i32
    %c0_i32_1 = arith.constant 0 : i32
    return %arg0, %0, %c0_i32, %c0_i32_0 : i32, i32, i32, i32
  }
  func.func @transform_2(%arg0: i32, %arg1: i32) -> (i32, i32, i32) {
    %c0_i32 = arith.constant 0 : i32
    %c0_i32_0 = arith.constant 0 : i32
    %c0_i32_1 = arith.constant 0 : i32
    %c0_i32_2 = arith.constant 0 : i32
    return %c0_i32, %c0_i32_0, %c0_i32_1 : i32, i32, i32
  }
  func.func @transform_3(%arg0: i32, %arg1: i32) -> (i32, i32) {
    %c0_i32 = arith.constant 0 : i32
    %c0_i32_0 = arith.constant 0 : i32
    %c0_i32_1 = arith.constant 0 : i32
    return %c0_i32, %c0_i32_0 : i32, i32
  }
  func.func @transform_4(%arg0: i32, %arg1: i32) -> (i32, i32, i32, i32) {
    %c0_i32 = arith.constant 0 : i32
    %c0_i32_0 = arith.constant 0 : i32
    %c0_i32_1 = arith.constant 0 : i32
    return %arg0, %arg1, %c0_i32, %c0_i32_0 : i32, i32, i32, i32
  }
}

module attributes {stable_mosaic.version = 11 : i64} {
  func.func @_conv2x2_kernel(%arg0: i32, %arg1: i32, %arg2: memref<1x1x9x64xbf16, #tpu.memory_space<vmem>>, %arg3: memref<1x1x9x64xbf16, #tpu.memory_space<vmem>>, %arg4: memref<4x64x16xbf16, #tpu.memory_space<vmem>>, %arg5: memref<1x16xf32, #tpu.memory_space<vmem>>, %arg6: memref<1x1x8x16xbf16, #tpu.memory_space<vmem>>) attributes {dimension_semantics = [#tpu.dimension_semantics<parallel>, #tpu.dimension_semantics<parallel>], iteration_bounds = array<i64: 2, 8>, scalar_prefetch = 0 : i64, scratch_operands = 0 : i64, tpu.core_type = #tpu.core_type<tc>, window_params = [{transform_indices = @transform_0, window_bounds = array<i64: 1, 1, 9, 64>}, {transform_indices = @transform_1, window_bounds = array<i64: 1, 1, 9, 64>}, {pipeline_mode = #tpu.pipeline_mode<synchronous>, transform_indices = @transform_2, window_bounds = array<i64: 4, 64, 16>}, {pipeline_mode = #tpu.pipeline_mode<synchronous>, transform_indices = @transform_3, window_bounds = array<i64: 1, 16>}, {transform_indices = @transform_4, window_bounds = array<i64: 1, 1, 8, 16>}]} {
    %c0 = arith.constant 0 : index
    %c0_0 = arith.constant 0 : index
    %c0_1 = arith.constant 0 : index
    %c0_2 = arith.constant 0 : index
    %0 = vector.load %arg2[%c0, %c0_0, %c0_1, %c0_2] : memref<1x1x9x64xbf16, #tpu.memory_space<vmem>>, vector<1x1x8x64xbf16>
    %1 = vector.shape_cast %0 : vector<1x1x8x64xbf16> to vector<8x64xbf16>
    %c0_3 = arith.constant 0 : index
    %c0_4 = arith.constant 0 : index
    %c0_5 = arith.constant 0 : index
    %2 = vector.load %arg4[%c0_3, %c0_4, %c0_5] : memref<4x64x16xbf16, #tpu.memory_space<vmem>>, vector<1x64x16xbf16>
    %3 = vector.shape_cast %2 : vector<1x64x16xbf16> to vector<64x16xbf16>
    %cst = arith.constant dense<0.000000e+00> : vector<8x16xf32>
    %4 = tpu.matmul %1, %3, %cst {dimension_numbers = #tpu.dot_dimension_numbers<[1], [0], [0], [1], [0, 0, 1, 1], [], []>} : vector<8x64xbf16>, vector<64x16xbf16>, vector<8x16xf32> -> vector<8x16xf32>
    %c0_6 = arith.constant 0 : index
    %c0_7 = arith.constant 0 : index
    %c1 = arith.constant 1 : index
    %c0_8 = arith.constant 0 : index
    %5 = vector.load %arg2[%c0_6, %c0_7, %c1, %c0_8] : memref<1x1x9x64xbf16, #tpu.memory_space<vmem>>, vector<1x1x8x64xbf16>
    %6 = vector.shape_cast %5 : vector<1x1x8x64xbf16> to vector<8x64xbf16>
    %c1_9 = arith.constant 1 : index
    %c0_10 = arith.constant 0 : index
    %c0_11 = arith.constant 0 : index
    %7 = vector.load %arg4[%c1_9, %c0_10, %c0_11] : memref<4x64x16xbf16, #tpu.memory_space<vmem>>, vector<1x64x16xbf16>
    %8 = vector.shape_cast %7 : vector<1x64x16xbf16> to vector<64x16xbf16>
    %cst_12 = arith.constant dense<0.000000e+00> : vector<8x16xf32>
    %9 = tpu.matmul %6, %8, %cst_12 {dimension_numbers = #tpu.dot_dimension_numbers<[1], [0], [0], [1], [0, 0, 1, 1], [], []>} : vector<8x64xbf16>, vector<64x16xbf16>, vector<8x16xf32> -> vector<8x16xf32>
    %10 = arith.addf %4, %9 : vector<8x16xf32>
    %c0_13 = arith.constant 0 : index
    %c0_14 = arith.constant 0 : index
    %c0_15 = arith.constant 0 : index
    %c0_16 = arith.constant 0 : index
    %11 = vector.load %arg3[%c0_13, %c0_14, %c0_15, %c0_16] : memref<1x1x9x64xbf16, #tpu.memory_space<vmem>>, vector<1x1x8x64xbf16>
    %12 = vector.shape_cast %11 : vector<1x1x8x64xbf16> to vector<8x64xbf16>
    %c2 = arith.constant 2 : index
    %c0_17 = arith.constant 0 : index
    %c0_18 = arith.constant 0 : index
    %13 = vector.load %arg4[%c2, %c0_17, %c0_18] : memref<4x64x16xbf16, #tpu.memory_space<vmem>>, vector<1x64x16xbf16>
    %14 = vector.shape_cast %13 : vector<1x64x16xbf16> to vector<64x16xbf16>
    %cst_19 = arith.constant dense<0.000000e+00> : vector<8x16xf32>
    %15 = tpu.matmul %12, %14, %cst_19 {dimension_numbers = #tpu.dot_dimension_numbers<[1], [0], [0], [1], [0, 0, 1, 1], [], []>} : vector<8x64xbf16>, vector<64x16xbf16>, vector<8x16xf32> -> vector<8x16xf32>
    %16 = arith.addf %10, %15 : vector<8x16xf32>
    %c0_20 = arith.constant 0 : index
    %c0_21 = arith.constant 0 : index
    %c1_22 = arith.constant 1 : index
    %c0_23 = arith.constant 0 : index
    %17 = vector.load %arg3[%c0_20, %c0_21, %c1_22, %c0_23] : memref<1x1x9x64xbf16, #tpu.memory_space<vmem>>, vector<1x1x8x64xbf16>
    %18 = vector.shape_cast %17 : vector<1x1x8x64xbf16> to vector<8x64xbf16>
    %c3 = arith.constant 3 : index
    %c0_24 = arith.constant 0 : index
    %c0_25 = arith.constant 0 : index
    %19 = vector.load %arg4[%c3, %c0_24, %c0_25] : memref<4x64x16xbf16, #tpu.memory_space<vmem>>, vector<1x64x16xbf16>
    %20 = vector.shape_cast %19 : vector<1x64x16xbf16> to vector<64x16xbf16>
    %cst_26 = arith.constant dense<0.000000e+00> : vector<8x16xf32>
    %21 = tpu.matmul %18, %20, %cst_26 {dimension_numbers = #tpu.dot_dimension_numbers<[1], [0], [0], [1], [0, 0, 1, 1], [], []>} : vector<8x64xbf16>, vector<64x16xbf16>, vector<8x16xf32> -> vector<8x16xf32>
    %22 = arith.addf %16, %21 : vector<8x16xf32>
    %c0_27 = arith.constant 0 : index
    %c0_28 = arith.constant 0 : index
    %23 = vector.load %arg5[%c0_27, %c0_28] : memref<1x16xf32, #tpu.memory_space<vmem>>, vector<1x16xf32>
    %24 = vector.broadcast %23 : vector<1x16xf32> to vector<8x16xf32>
    %25 = arith.addf %22, %24 : vector<8x16xf32>
    %cst_29 = arith.constant 0.000000e+00 : f32
    %26 = vector.broadcast %cst_29 : f32 to vector<8x16xf32>
    %27 = arith.maximumf %25, %26 : vector<8x16xf32>
    %28 = arith.truncf %27 : vector<8x16xf32> to vector<8x16xbf16>
    %c0_30 = arith.constant 0 : index
    %c0_31 = arith.constant 0 : index
    %c0_32 = arith.constant 0 : index
    %c0_33 = arith.constant 0 : index
    %29 = vector.load %arg6[%c0_30, %c0_31, %c0_32, %c0_33] : memref<1x1x8x16xbf16, #tpu.memory_space<vmem>>, vector<1x1x8x16xbf16>
    %30 = vector.shape_cast %29 : vector<1x1x8x16xbf16> to vector<8x16xbf16>
    %31 = vector.shape_cast %28 : vector<8x16xbf16> to vector<1x1x8x16xbf16>
    tpu.vector_store %arg6[%c0_30, %c0_31, %c0_32, %c0_33], %31 {strides = array<i32>} : memref<1x1x8x16xbf16, #tpu.memory_space<vmem>>, vector<1x1x8x16xbf16>,
    return
  }
  func.func @transform_0(%arg0: i32, %arg1: i32) -> (i32, i32, i32, i32) {
    %c0_i32 = arith.constant 0 : i32
    %c0_i32_0 = arith.constant 0 : i32
    %c0_i32_1 = arith.constant 0 : i32
    return %arg0, %arg1, %c0_i32, %c0_i32_0 : i32, i32, i32, i32
  }
  func.func @transform_1(%arg0: i32, %arg1: i32) -> (i32, i32, i32, i32) {
    %c1_i32 = arith.constant 1 : i32
    %0 = arith.addi %arg1, %c1_i32 : i32
    %c0_i32 = arith.constant 0 : i32
    %c0_i32_0 = arith.constant 0 : i32
    %c0_i32_1 = arith.constant 0 : i32
    return %arg0, %0, %c0_i32, %c0_i32_0 : i32, i32, i32, i32
  }
  func.func @transform_2(%arg0: i32, %arg1: i32) -> (i32, i32, i32) {
    %c0_i32 = arith.constant 0 : i32
    %c0_i32_0 = arith.constant 0 : i32
    %c0_i32_1 = arith.constant 0 : i32
    %c0_i32_2 = arith.constant 0 : i32
    return %c0_i32, %c0_i32_0, %c0_i32_1 : i32, i32, i32
  }
  func.func @transform_3(%arg0: i32, %arg1: i32) -> (i32, i32) {
    %c0_i32 = arith.constant 0 : i32
    %c0_i32_0 = arith.constant 0 : i32
    %c0_i32_1 = arith.constant 0 : i32
    return %c0_i32, %c0_i32_0 : i32, i32
  }
  func.func @transform_4(%arg0: i32, %arg1: i32) -> (i32, i32, i32, i32) {
    %c0_i32 = arith.constant 0 : i32
    %c0_i32_0 = arith.constant 0 : i32
    %c0_i32_1 = arith.constant 0 : i32
    return %arg0, %arg1, %c0_i32, %c0_i32_0 : i32, i32, i32, i32
  }
}

module attributes {stable_mosaic.version = 11 : i64} {
  func.func @_conv2x2_kernel(%arg0: i32, %arg1: i32, %arg2: memref<1x1x5x64xbf16, #tpu.memory_space<vmem>>, %arg3: memref<1x1x5x64xbf16, #tpu.memory_space<vmem>>, %arg4: memref<4x64x16xbf16, #tpu.memory_space<vmem>>, %arg5: memref<1x16xf32, #tpu.memory_space<vmem>>, %arg6: memref<1x1x4x16xbf16, #tpu.memory_space<vmem>>) attributes {dimension_semantics = [#tpu.dimension_semantics<parallel>, #tpu.dimension_semantics<parallel>], iteration_bounds = array<i64: 2, 4>, scalar_prefetch = 0 : i64, scratch_operands = 0 : i64, tpu.core_type = #tpu.core_type<tc>, window_params = [{transform_indices = @transform_0, window_bounds = array<i64: 1, 1, 5, 64>}, {transform_indices = @transform_1, window_bounds = array<i64: 1, 1, 5, 64>}, {pipeline_mode = #tpu.pipeline_mode<synchronous>, transform_indices = @transform_2, window_bounds = array<i64: 4, 64, 16>}, {pipeline_mode = #tpu.pipeline_mode<synchronous>, transform_indices = @transform_3, window_bounds = array<i64: 1, 16>}, {transform_indices = @transform_4, window_bounds = array<i64: 1, 1, 4, 16>}]} {
    %c0 = arith.constant 0 : index
    %c0_0 = arith.constant 0 : index
    %c0_1 = arith.constant 0 : index
    %c0_2 = arith.constant 0 : index
    %0 = vector.load %arg2[%c0, %c0_0, %c0_1, %c0_2] : memref<1x1x5x64xbf16, #tpu.memory_space<vmem>>, vector<1x1x4x64xbf16>
    %1 = vector.shape_cast %0 : vector<1x1x4x64xbf16> to vector<4x64xbf16>
    %c0_3 = arith.constant 0 : index
    %c0_4 = arith.constant 0 : index
    %c0_5 = arith.constant 0 : index
    %2 = vector.load %arg4[%c0_3, %c0_4, %c0_5] : memref<4x64x16xbf16, #tpu.memory_space<vmem>>, vector<1x64x16xbf16>
    %3 = vector.shape_cast %2 : vector<1x64x16xbf16> to vector<64x16xbf16>
    %cst = arith.constant dense<0.000000e+00> : vector<4x16xf32>
    %4 = tpu.matmul %1, %3, %cst {dimension_numbers = #tpu.dot_dimension_numbers<[1], [0], [0], [1], [0, 0, 1, 1], [], []>} : vector<4x64xbf16>, vector<64x16xbf16>, vector<4x16xf32> -> vector<4x16xf32>
    %c0_6 = arith.constant 0 : index
    %c0_7 = arith.constant 0 : index
    %c1 = arith.constant 1 : index
    %c0_8 = arith.constant 0 : index
    %5 = vector.load %arg2[%c0_6, %c0_7, %c1, %c0_8] : memref<1x1x5x64xbf16, #tpu.memory_space<vmem>>, vector<1x1x4x64xbf16>
    %6 = vector.shape_cast %5 : vector<1x1x4x64xbf16> to vector<4x64xbf16>
    %c1_9 = arith.constant 1 : index
    %c0_10 = arith.constant 0 : index
    %c0_11 = arith.constant 0 : index
    %7 = vector.load %arg4[%c1_9, %c0_10, %c0_11] : memref<4x64x16xbf16, #tpu.memory_space<vmem>>, vector<1x64x16xbf16>
    %8 = vector.shape_cast %7 : vector<1x64x16xbf16> to vector<64x16xbf16>
    %cst_12 = arith.constant dense<0.000000e+00> : vector<4x16xf32>
    %9 = tpu.matmul %6, %8, %cst_12 {dimension_numbers = #tpu.dot_dimension_numbers<[1], [0], [0], [1], [0, 0, 1, 1], [], []>} : vector<4x64xbf16>, vector<64x16xbf16>, vector<4x16xf32> -> vector<4x16xf32>
    %10 = arith.addf %4, %9 : vector<4x16xf32>
    %c0_13 = arith.constant 0 : index
    %c0_14 = arith.constant 0 : index
    %c0_15 = arith.constant 0 : index
    %c0_16 = arith.constant 0 : index
    %11 = vector.load %arg3[%c0_13, %c0_14, %c0_15, %c0_16] : memref<1x1x5x64xbf16, #tpu.memory_space<vmem>>, vector<1x1x4x64xbf16>
    %12 = vector.shape_cast %11 : vector<1x1x4x64xbf16> to vector<4x64xbf16>
    %c2 = arith.constant 2 : index
    %c0_17 = arith.constant 0 : index
    %c0_18 = arith.constant 0 : index
    %13 = vector.load %arg4[%c2, %c0_17, %c0_18] : memref<4x64x16xbf16, #tpu.memory_space<vmem>>, vector<1x64x16xbf16>
    %14 = vector.shape_cast %13 : vector<1x64x16xbf16> to vector<64x16xbf16>
    %cst_19 = arith.constant dense<0.000000e+00> : vector<4x16xf32>
    %15 = tpu.matmul %12, %14, %cst_19 {dimension_numbers = #tpu.dot_dimension_numbers<[1], [0], [0], [1], [0, 0, 1, 1], [], []>} : vector<4x64xbf16>, vector<64x16xbf16>, vector<4x16xf32> -> vector<4x16xf32>
    %16 = arith.addf %10, %15 : vector<4x16xf32>
    %c0_20 = arith.constant 0 : index
    %c0_21 = arith.constant 0 : index
    %c1_22 = arith.constant 1 : index
    %c0_23 = arith.constant 0 : index
    %17 = vector.load %arg3[%c0_20, %c0_21, %c1_22, %c0_23] : memref<1x1x5x64xbf16, #tpu.memory_space<vmem>>, vector<1x1x4x64xbf16>
    %18 = vector.shape_cast %17 : vector<1x1x4x64xbf16> to vector<4x64xbf16>
    %c3 = arith.constant 3 : index
    %c0_24 = arith.constant 0 : index
    %c0_25 = arith.constant 0 : index
    %19 = vector.load %arg4[%c3, %c0_24, %c0_25] : memref<4x64x16xbf16, #tpu.memory_space<vmem>>, vector<1x64x16xbf16>
    %20 = vector.shape_cast %19 : vector<1x64x16xbf16> to vector<64x16xbf16>
    %cst_26 = arith.constant dense<0.000000e+00> : vector<4x16xf32>
    %21 = tpu.matmul %18, %20, %cst_26 {dimension_numbers = #tpu.dot_dimension_numbers<[1], [0], [0], [1], [0, 0, 1, 1], [], []>} : vector<4x64xbf16>, vector<64x16xbf16>, vector<4x16xf32> -> vector<4x16xf32>
    %22 = arith.addf %16, %21 : vector<4x16xf32>
    %c0_27 = arith.constant 0 : index
    %c0_28 = arith.constant 0 : index
    %23 = vector.load %arg5[%c0_27, %c0_28] : memref<1x16xf32, #tpu.memory_space<vmem>>, vector<1x16xf32>
    %24 = vector.broadcast %23 : vector<1x16xf32> to vector<4x16xf32>
    %25 = arith.addf %22, %24 : vector<4x16xf32>
    %cst_29 = arith.constant 0.000000e+00 : f32
    %26 = vector.broadcast %cst_29 : f32 to vector<4x16xf32>
    %27 = arith.maximumf %25, %26 : vector<4x16xf32>
    %28 = arith.truncf %27 : vector<4x16xf32> to vector<4x16xbf16>
    %c0_30 = arith.constant 0 : index
    %c0_31 = arith.constant 0 : index
    %c0_32 = arith.constant 0 : index
    %c0_33 = arith.constant 0 : index
    %29 = vector.load %arg6[%c0_30, %c0_31, %c0_32, %c0_33] : memref<1x1x4x16xbf16, #tpu.memory_space<vmem>>, vector<1x1x4x16xbf16>
    %30 = vector.shape_cast %29 : vector<1x1x4x16xbf16> to vector<4x16xbf16>
    %31 = vector.shape_cast %28 : vector<4x16xbf16> to vector<1x1x4x16xbf16>
    tpu.vector_store %arg6[%c0_30, %c0_31, %c0_32, %c0_33], %31 {strides = array<i32>} : memref<1x1x4x16xbf16, #tpu.memory_space<vmem>>, vector<1x1x4x16xbf16>,
    return
  }
  func.func @transform_0(%arg0: i32, %arg1: i32) -> (i32, i32, i32, i32) {
    %c0_i32 = arith.constant 0 : i32
    %c0_i32_0 = arith.constant 0 : i32
    %c0_i32_1 = arith.constant 0 : i32
    return %arg0, %arg1, %c0_i32, %c0_i32_0 : i32, i32, i32, i32
  }
  func.func @transform_1(%arg0: i32, %arg1: i32) -> (i32, i32, i32, i32) {
    %c1_i32 = arith.constant 1 : i32
    %0 = arith.addi %arg1, %c1_i32 : i32
    %c0_i32 = arith.constant 0 : i32
    %c0_i32_0 = arith.constant 0 : i32
    %c0_i32_1 = arith.constant 0 : i32
    return %arg0, %0, %c0_i32, %c0_i32_0 : i32, i32, i32, i32
  }
  func.func @transform_2(%arg0: i32, %arg1: i32) -> (i32, i32, i32) {
    %c0_i32 = arith.constant 0 : i32
    %c0_i32_0 = arith.constant 0 : i32
    %c0_i32_1 = arith.constant 0 : i32
    %c0_i32_2 = arith.constant 0 : i32
    return %c0_i32, %c0_i32_0, %c0_i32_1 : i32, i32, i32
  }
  func.func @transform_3(%arg0: i32, %arg1: i32) -> (i32, i32) {
    %c0_i32 = arith.constant 0 : i32
    %c0_i32_0 = arith.constant 0 : i32
    %c0_i32_1 = arith.constant 0 : i32
    return %c0_i32, %c0_i32_0 : i32, i32
  }
  func.func @transform_4(%arg0: i32, %arg1: i32) -> (i32, i32, i32, i32) {
    %c0_i32 = arith.constant 0 : i32
    %c0_i32_0 = arith.constant 0 : i32
    %c0_i32_1 = arith.constant 0 : i32
    return %arg0, %arg1, %c0_i32, %c0_i32_0 : i32, i32, i32, i32
  }
}

module attributes {stable_mosaic.version = 11 : i64} {
  func.func @_enc_head_kernel(%arg0: i32, %arg1: memref<32x16xbf16, #tpu.memory_space<vmem>>, %arg2: memref<16x16xbf16, #tpu.memory_space<vmem>>, %arg3: memref<1x16xf32, #tpu.memory_space<vmem>>, %arg4: memref<32x16xf32, #tpu.memory_space<vmem>>, %arg5: memref<16x32xbf16, #tpu.memory_space<vmem>>, %arg6: memref<32x32xbf16, #tpu.memory_space<vmem>>) attributes {dimension_semantics = [#tpu.dimension_semantics<parallel>], iteration_bounds = array<i64: 1>, scalar_prefetch = 0 : i64, scratch_operands = 0 : i64, tpu.core_type = #tpu.core_type<tc>, window_params = [{transform_indices = @transform_0, window_bounds = array<i64: 32, 16>}, {pipeline_mode = #tpu.pipeline_mode<synchronous>, transform_indices = @transform_1, window_bounds = array<i64: 16, 16>}, {pipeline_mode = #tpu.pipeline_mode<synchronous>, transform_indices = @transform_2, window_bounds = array<i64: 1, 16>}, {transform_indices = @transform_3, window_bounds = array<i64: 32, 16>}, {pipeline_mode = #tpu.pipeline_mode<synchronous>, transform_indices = @transform_4, window_bounds = array<i64: 16, 32>}, {transform_indices = @transform_5, window_bounds = array<i64: 32, 32>}]} {
    %c0 = arith.constant 0 : index
    %c0_0 = arith.constant 0 : index
    %0 = vector.load %arg1[%c0, %c0_0] : memref<32x16xbf16, #tpu.memory_space<vmem>>, vector<32x16xbf16>
    %c0_1 = arith.constant 0 : index
    %c0_2 = arith.constant 0 : index
    %1 = vector.load %arg2[%c0_1, %c0_2] : memref<16x16xbf16, #tpu.memory_space<vmem>>, vector<16x16xbf16>
    %cst = arith.constant dense<0.000000e+00> : vector<32x16xf32>
    %2 = tpu.matmul %0, %1, %cst {dimension_numbers = #tpu.dot_dimension_numbers<[1], [0], [0], [1], [0, 0, 1, 1], [], []>} : vector<32x16xbf16>, vector<16x16xbf16>, vector<32x16xf32> -> vector<32x16xf32>
    %c0_3 = arith.constant 0 : index
    %c0_4 = arith.constant 0 : index
    %3 = vector.load %arg3[%c0_3, %c0_4] : memref<1x16xf32, #tpu.memory_space<vmem>>, vector<1x16xf32>
    %4 = vector.broadcast %3 : vector<1x16xf32> to vector<32x16xf32>
    %5 = arith.addf %2, %4 : vector<32x16xf32>
    %c0_5 = arith.constant 0 : index
    %c0_6 = arith.constant 0 : index
    %6 = vector.load %arg4[%c0_5, %c0_6] : memref<32x16xf32, #tpu.memory_space<vmem>>, vector<32x16xf32>
    %7 = arith.addf %5, %6 : vector<32x16xf32>
    %cst_7 = arith.constant 1.000000e+00 : f32
    %8 = vector.broadcast %cst_7 : f32 to vector<32x16xf32>
    %9 = arith.mulf %7, %8 : vector<32x16xf32>
    %cst_8 = arith.constant dense<0xFF800000> : vector<32xf32>
    %10 = vector.multi_reduction <maximumf>, %9, %cst_8 [1] : vector<32x16xf32> to vector<32xf32>
    %11 = vector.shape_cast %10 : vector<32xf32> to vector<32x1xf32>
    %12 = vector.broadcast %11 : vector<32x1xf32> to vector<32x16xf32>
    %13 = arith.subf %9, %12 : vector<32x16xf32>
    %14 = math.exp %13 : vector<32x16xf32>
    %cst_9 = arith.constant dense<0.000000e+00> : vector<32xf32>
    %15 = vector.multi_reduction <add>, %14, %cst_9 [1] : vector<32x16xf32> to vector<32xf32>
    %16 = vector.shape_cast %15 : vector<32xf32> to vector<32x1xf32>
    %17 = tpu.reciprocal %16 {approx = true} : vector<32x1xf32> -> vector<32x1xf32>
    %18 = vector.broadcast %17 : vector<32x1xf32> to vector<32x16xf32>
    %19 = arith.mulf %14, %18 : vector<32x16xf32>
    %20 = arith.truncf %19 : vector<32x16xf32> to vector<32x16xbf16>
    %c0_10 = arith.constant 0 : index
    %c0_11 = arith.constant 0 : index
    %21 = vector.load %arg5[%c0_10, %c0_11] : memref<16x32xbf16, #tpu.memory_space<vmem>>, vector<16x32xbf16>
    %cst_12 = arith.constant dense<0.000000e+00> : vector<32x32xf32>
    %22 = tpu.matmul %20, %21, %cst_12 {dimension_numbers = #tpu.dot_dimension_numbers<[1], [0], [0], [1], [0, 0, 1, 1], [], []>} : vector<32x16xbf16>, vector<16x32xbf16>, vector<32x32xf32> -> vector<32x32xf32>
    %23 = arith.truncf %22 : vector<32x32xf32> to vector<32x32xbf16>
    %c0_13 = arith.constant 0 : index
    %c0_14 = arith.constant 0 : index
    %24 = vector.load %arg6[%c0_13, %c0_14] : memref<32x32xbf16, #tpu.memory_space<vmem>>, vector<32x32xbf16>
    tpu.vector_store %arg6[%c0_13, %c0_14], %23 {strides = array<i32>} : memref<32x32xbf16, #tpu.memory_space<vmem>>, vector<32x32xbf16>,
    return
  }
  func.func @transform_0(%arg0: i32) -> (i32, i32) {
    %c0_i32 = arith.constant 0 : i32
    %c0_i32_0 = arith.constant 0 : i32
    return %arg0, %c0_i32 : i32, i32
  }
  func.func @transform_1(%arg0: i32) -> (i32, i32) {
    %c0_i32 = arith.constant 0 : i32
    %c0_i32_0 = arith.constant 0 : i32
    %c0_i32_1 = arith.constant 0 : i32
    return %c0_i32, %c0_i32_0 : i32, i32
  }
  func.func @transform_2(%arg0: i32) -> (i32, i32) {
    %c0_i32 = arith.constant 0 : i32
    %c0_i32_0 = arith.constant 0 : i32
    %c0_i32_1 = arith.constant 0 : i32
    return %c0_i32, %c0_i32_0 : i32, i32
  }
  func.func @transform_3(%arg0: i32) -> (i32, i32) {
    %c0_i32 = arith.constant 0 : i32
    %c0_i32_0 = arith.constant 0 : i32
    return %arg0, %c0_i32 : i32, i32
  }
  func.func @transform_4(%arg0: i32) -> (i32, i32) {
    %c0_i32 = arith.constant 0 : i32
    %c0_i32_0 = arith.constant 0 : i32
    %c0_i32_1 = arith.constant 0 : i32
    return %c0_i32, %c0_i32_0 : i32, i32
  }
  func.func @transform_5(%arg0: i32) -> (i32, i32) {
    %c0_i32 = arith.constant 0 : i32
    %c0_i32_0 = arith.constant 0 : i32
    return %arg0, %c0_i32 : i32, i32
  }
}

module attributes {stable_mosaic.version = 11 : i64} {
  func.func @_conv2x2_kernel(%arg0: i32, %arg1: i32, %arg2: memref<1x1x6x32xbf16, #tpu.memory_space<vmem>>, %arg3: memref<1x1x6x32xbf16, #tpu.memory_space<vmem>>, %arg4: memref<4x32x64xbf16, #tpu.memory_space<vmem>>, %arg5: memref<1x64xf32, #tpu.memory_space<vmem>>, %arg6: memref<1x1x5x64xbf16, #tpu.memory_space<vmem>>) attributes {dimension_semantics = [#tpu.dimension_semantics<parallel>, #tpu.dimension_semantics<parallel>], iteration_bounds = array<i64: 2, 5>, scalar_prefetch = 0 : i64, scratch_operands = 0 : i64, tpu.core_type = #tpu.core_type<tc>, window_params = [{transform_indices = @transform_0, window_bounds = array<i64: 1, 1, 6, 32>}, {transform_indices = @transform_1, window_bounds = array<i64: 1, 1, 6, 32>}, {pipeline_mode = #tpu.pipeline_mode<synchronous>, transform_indices = @transform_2, window_bounds = array<i64: 4, 32, 64>}, {pipeline_mode = #tpu.pipeline_mode<synchronous>, transform_indices = @transform_3, window_bounds = array<i64: 1, 64>}, {transform_indices = @transform_4, window_bounds = array<i64: 1, 1, 5, 64>}]} {
    %c0 = arith.constant 0 : index
    %c0_0 = arith.constant 0 : index
    %c0_1 = arith.constant 0 : index
    %c0_2 = arith.constant 0 : index
    %0 = vector.load %arg2[%c0, %c0_0, %c0_1, %c0_2] : memref<1x1x6x32xbf16, #tpu.memory_space<vmem>>, vector<1x1x5x32xbf16>
    %1 = vector.shape_cast %0 : vector<1x1x5x32xbf16> to vector<5x32xbf16>
    %c0_3 = arith.constant 0 : index
    %c0_4 = arith.constant 0 : index
    %c0_5 = arith.constant 0 : index
    %2 = vector.load %arg4[%c0_3, %c0_4, %c0_5] : memref<4x32x64xbf16, #tpu.memory_space<vmem>>, vector<1x32x64xbf16>
    %3 = vector.shape_cast %2 : vector<1x32x64xbf16> to vector<32x64xbf16>
    %cst = arith.constant dense<0.000000e+00> : vector<5x64xf32>
    %4 = tpu.matmul %1, %3, %cst {dimension_numbers = #tpu.dot_dimension_numbers<[1], [0], [0], [1], [0, 0, 1, 1], [], []>} : vector<5x32xbf16>, vector<32x64xbf16>, vector<5x64xf32> -> vector<5x64xf32>
    %c0_6 = arith.constant 0 : index
    %c0_7 = arith.constant 0 : index
    %c1 = arith.constant 1 : index
    %c0_8 = arith.constant 0 : index
    %5 = vector.load %arg2[%c0_6, %c0_7, %c1, %c0_8] : memref<1x1x6x32xbf16, #tpu.memory_space<vmem>>, vector<1x1x5x32xbf16>
    %6 = vector.shape_cast %5 : vector<1x1x5x32xbf16> to vector<5x32xbf16>
    %c1_9 = arith.constant 1 : index
    %c0_10 = arith.constant 0 : index
    %c0_11 = arith.constant 0 : index
    %7 = vector.load %arg4[%c1_9, %c0_10, %c0_11] : memref<4x32x64xbf16, #tpu.memory_space<vmem>>, vector<1x32x64xbf16>
    %8 = vector.shape_cast %7 : vector<1x32x64xbf16> to vector<32x64xbf16>
    %cst_12 = arith.constant dense<0.000000e+00> : vector<5x64xf32>
    %9 = tpu.matmul %6, %8, %cst_12 {dimension_numbers = #tpu.dot_dimension_numbers<[1], [0], [0], [1], [0, 0, 1, 1], [], []>} : vector<5x32xbf16>, vector<32x64xbf16>, vector<5x64xf32> -> vector<5x64xf32>
    %10 = arith.addf %4, %9 : vector<5x64xf32>
    %c0_13 = arith.constant 0 : index
    %c0_14 = arith.constant 0 : index
    %c0_15 = arith.constant 0 : index
    %c0_16 = arith.constant 0 : index
    %11 = vector.load %arg3[%c0_13, %c0_14, %c0_15, %c0_16] : memref<1x1x6x32xbf16, #tpu.memory_space<vmem>>, vector<1x1x5x32xbf16>
    %12 = vector.shape_cast %11 : vector<1x1x5x32xbf16> to vector<5x32xbf16>
    %c2 = arith.constant 2 : index
    %c0_17 = arith.constant 0 : index
    %c0_18 = arith.constant 0 : index
    %13 = vector.load %arg4[%c2, %c0_17, %c0_18] : memref<4x32x64xbf16, #tpu.memory_space<vmem>>, vector<1x32x64xbf16>
    %14 = vector.shape_cast %13 : vector<1x32x64xbf16> to vector<32x64xbf16>
    %cst_19 = arith.constant dense<0.000000e+00> : vector<5x64xf32>
    %15 = tpu.matmul %12, %14, %cst_19 {dimension_numbers = #tpu.dot_dimension_numbers<[1], [0], [0], [1], [0, 0, 1, 1], [], []>} : vector<5x32xbf16>, vector<32x64xbf16>, vector<5x64xf32> -> vector<5x64xf32>
    %16 = arith.addf %10, %15 : vector<5x64xf32>
    %c0_20 = arith.constant 0 : index
    %c0_21 = arith.constant 0 : index
    %c1_22 = arith.constant 1 : index
    %c0_23 = arith.constant 0 : index
    %17 = vector.load %arg3[%c0_20, %c0_21, %c1_22, %c0_23] : memref<1x1x6x32xbf16, #tpu.memory_space<vmem>>, vector<1x1x5x32xbf16>
    %18 = vector.shape_cast %17 : vector<1x1x5x32xbf16> to vector<5x32xbf16>
    %c3 = arith.constant 3 : index
    %c0_24 = arith.constant 0 : index
    %c0_25 = arith.constant 0 : index
    %19 = vector.load %arg4[%c3, %c0_24, %c0_25] : memref<4x32x64xbf16, #tpu.memory_space<vmem>>, vector<1x32x64xbf16>
    %20 = vector.shape_cast %19 : vector<1x32x64xbf16> to vector<32x64xbf16>
    %cst_26 = arith.constant dense<0.000000e+00> : vector<5x64xf32>
    %21 = tpu.matmul %18, %20, %cst_26 {dimension_numbers = #tpu.dot_dimension_numbers<[1], [0], [0], [1], [0, 0, 1, 1], [], []>} : vector<5x32xbf16>, vector<32x64xbf16>, vector<5x64xf32> -> vector<5x64xf32>
    %22 = arith.addf %16, %21 : vector<5x64xf32>
    %c0_27 = arith.constant 0 : index
    %c0_28 = arith.constant 0 : index
    %23 = vector.load %arg5[%c0_27, %c0_28] : memref<1x64xf32, #tpu.memory_space<vmem>>, vector<1x64xf32>
    %24 = vector.broadcast %23 : vector<1x64xf32> to vector<5x64xf32>
    %25 = arith.addf %22, %24 : vector<5x64xf32>
    %cst_29 = arith.constant 0.000000e+00 : f32
    %26 = vector.broadcast %cst_29 : f32 to vector<5x64xf32>
    %27 = arith.maximumf %25, %26 : vector<5x64xf32>
    %28 = arith.truncf %27 : vector<5x64xf32> to vector<5x64xbf16>
    %c0_30 = arith.constant 0 : index
    %c0_31 = arith.constant 0 : index
    %c0_32 = arith.constant 0 : index
    %c0_33 = arith.constant 0 : index
    %29 = vector.load %arg6[%c0_30, %c0_31, %c0_32, %c0_33] : memref<1x1x5x64xbf16, #tpu.memory_space<vmem>>, vector<1x1x5x64xbf16>
    %30 = vector.shape_cast %29 : vector<1x1x5x64xbf16> to vector<5x64xbf16>
    %31 = vector.shape_cast %28 : vector<5x64xbf16> to vector<1x1x5x64xbf16>
    tpu.vector_store %arg6[%c0_30, %c0_31, %c0_32, %c0_33], %31 {strides = array<i32>} : memref<1x1x5x64xbf16, #tpu.memory_space<vmem>>, vector<1x1x5x64xbf16>,
    return
  }
  func.func @transform_0(%arg0: i32, %arg1: i32) -> (i32, i32, i32, i32) {
    %c0_i32 = arith.constant 0 : i32
    %c0_i32_0 = arith.constant 0 : i32
    %c0_i32_1 = arith.constant 0 : i32
    return %arg0, %arg1, %c0_i32, %c0_i32_0 : i32, i32, i32, i32
  }
  func.func @transform_1(%arg0: i32, %arg1: i32) -> (i32, i32, i32, i32) {
    %c1_i32 = arith.constant 1 : i32
    %0 = arith.addi %arg1, %c1_i32 : i32
    %c0_i32 = arith.constant 0 : i32
    %c0_i32_0 = arith.constant 0 : i32
    %c0_i32_1 = arith.constant 0 : i32
    return %arg0, %0, %c0_i32, %c0_i32_0 : i32, i32, i32, i32
  }
  func.func @transform_2(%arg0: i32, %arg1: i32) -> (i32, i32, i32) {
    %c0_i32 = arith.constant 0 : i32
    %c0_i32_0 = arith.constant 0 : i32
    %c0_i32_1 = arith.constant 0 : i32
    %c0_i32_2 = arith.constant 0 : i32
    return %c0_i32, %c0_i32_0, %c0_i32_1 : i32, i32, i32
  }
  func.func @transform_3(%arg0: i32, %arg1: i32) -> (i32, i32) {
    %c0_i32 = arith.constant 0 : i32
    %c0_i32_0 = arith.constant 0 : i32
    %c0_i32_1 = arith.constant 0 : i32
    return %c0_i32, %c0_i32_0 : i32, i32
  }
  func.func @transform_4(%arg0: i32, %arg1: i32) -> (i32, i32, i32, i32) {
    %c0_i32 = arith.constant 0 : i32
    %c0_i32_0 = arith.constant 0 : i32
    %c0_i32_1 = arith.constant 0 : i32
    return %arg0, %arg1, %c0_i32, %c0_i32_0 : i32, i32, i32, i32
  }
}

module attributes {stable_mosaic.version = 11 : i64} {
  func.func @_conv2x2_kernel(%arg0: i32, %arg1: i32, %arg2: memref<1x1x10x16xbf16, #tpu.memory_space<vmem>>, %arg3: memref<1x1x10x16xbf16, #tpu.memory_space<vmem>>, %arg4: memref<4x16x64xbf16, #tpu.memory_space<vmem>>, %arg5: memref<1x64xf32, #tpu.memory_space<vmem>>, %arg6: memref<1x1x9x64xbf16, #tpu.memory_space<vmem>>) attributes {dimension_semantics = [#tpu.dimension_semantics<parallel>, #tpu.dimension_semantics<parallel>], iteration_bounds = array<i64: 2, 9>, scalar_prefetch = 0 : i64, scratch_operands = 0 : i64, tpu.core_type = #tpu.core_type<tc>, window_params = [{transform_indices = @transform_0, window_bounds = array<i64: 1, 1, 10, 16>}, {transform_indices = @transform_1, window_bounds = array<i64: 1, 1, 10, 16>}, {pipeline_mode = #tpu.pipeline_mode<synchronous>, transform_indices = @transform_2, window_bounds = array<i64: 4, 16, 64>}, {pipeline_mode = #tpu.pipeline_mode<synchronous>, transform_indices = @transform_3, window_bounds = array<i64: 1, 64>}, {transform_indices = @transform_4, window_bounds = array<i64: 1, 1, 9, 64>}]} {
    %c0 = arith.constant 0 : index
    %c0_0 = arith.constant 0 : index
    %c0_1 = arith.constant 0 : index
    %c0_2 = arith.constant 0 : index
    %0 = vector.load %arg2[%c0, %c0_0, %c0_1, %c0_2] : memref<1x1x10x16xbf16, #tpu.memory_space<vmem>>, vector<1x1x9x16xbf16>
    %1 = vector.shape_cast %0 : vector<1x1x9x16xbf16> to vector<9x16xbf16>
    %c0_3 = arith.constant 0 : index
    %c0_4 = arith.constant 0 : index
    %c0_5 = arith.constant 0 : index
    %2 = vector.load %arg4[%c0_3, %c0_4, %c0_5] : memref<4x16x64xbf16, #tpu.memory_space<vmem>>, vector<1x16x64xbf16>
    %3 = vector.shape_cast %2 : vector<1x16x64xbf16> to vector<16x64xbf16>
    %cst = arith.constant dense<0.000000e+00> : vector<9x64xf32>
    %4 = tpu.matmul %1, %3, %cst {dimension_numbers = #tpu.dot_dimension_numbers<[1], [0], [0], [1], [0, 0, 1, 1], [], []>} : vector<9x16xbf16>, vector<16x64xbf16>, vector<9x64xf32> -> vector<9x64xf32>
    %c0_6 = arith.constant 0 : index
    %c0_7 = arith.constant 0 : index
    %c1 = arith.constant 1 : index
    %c0_8 = arith.constant 0 : index
    %5 = vector.load %arg2[%c0_6, %c0_7, %c1, %c0_8] : memref<1x1x10x16xbf16, #tpu.memory_space<vmem>>, vector<1x1x9x16xbf16>
    %6 = vector.shape_cast %5 : vector<1x1x9x16xbf16> to vector<9x16xbf16>
    %c1_9 = arith.constant 1 : index
    %c0_10 = arith.constant 0 : index
    %c0_11 = arith.constant 0 : index
    %7 = vector.load %arg4[%c1_9, %c0_10, %c0_11] : memref<4x16x64xbf16, #tpu.memory_space<vmem>>, vector<1x16x64xbf16>
    %8 = vector.shape_cast %7 : vector<1x16x64xbf16> to vector<16x64xbf16>
    %cst_12 = arith.constant dense<0.000000e+00> : vector<9x64xf32>
    %9 = tpu.matmul %6, %8, %cst_12 {dimension_numbers = #tpu.dot_dimension_numbers<[1], [0], [0], [1], [0, 0, 1, 1], [], []>} : vector<9x16xbf16>, vector<16x64xbf16>, vector<9x64xf32> -> vector<9x64xf32>
    %10 = arith.addf %4, %9 : vector<9x64xf32>
    %c0_13 = arith.constant 0 : index
    %c0_14 = arith.constant 0 : index
    %c0_15 = arith.constant 0 : index
    %c0_16 = arith.constant 0 : index
    %11 = vector.load %arg3[%c0_13, %c0_14, %c0_15, %c0_16] : memref<1x1x10x16xbf16, #tpu.memory_space<vmem>>, vector<1x1x9x16xbf16>
    %12 = vector.shape_cast %11 : vector<1x1x9x16xbf16> to vector<9x16xbf16>
    %c2 = arith.constant 2 : index
    %c0_17 = arith.constant 0 : index
    %c0_18 = arith.constant 0 : index
    %13 = vector.load %arg4[%c2, %c0_17, %c0_18] : memref<4x16x64xbf16, #tpu.memory_space<vmem>>, vector<1x16x64xbf16>
    %14 = vector.shape_cast %13 : vector<1x16x64xbf16> to vector<16x64xbf16>
    %cst_19 = arith.constant dense<0.000000e+00> : vector<9x64xf32>
    %15 = tpu.matmul %12, %14, %cst_19 {dimension_numbers = #tpu.dot_dimension_numbers<[1], [0], [0], [1], [0, 0, 1, 1], [], []>} : vector<9x16xbf16>, vector<16x64xbf16>, vector<9x64xf32> -> vector<9x64xf32>
    %16 = arith.addf %10, %15 : vector<9x64xf32>
    %c0_20 = arith.constant 0 : index
    %c0_21 = arith.constant 0 : index
    %c1_22 = arith.constant 1 : index
    %c0_23 = arith.constant 0 : index
    %17 = vector.load %arg3[%c0_20, %c0_21, %c1_22, %c0_23] : memref<1x1x10x16xbf16, #tpu.memory_space<vmem>>, vector<1x1x9x16xbf16>
    %18 = vector.shape_cast %17 : vector<1x1x9x16xbf16> to vector<9x16xbf16>
    %c3 = arith.constant 3 : index
    %c0_24 = arith.constant 0 : index
    %c0_25 = arith.constant 0 : index
    %19 = vector.load %arg4[%c3, %c0_24, %c0_25] : memref<4x16x64xbf16, #tpu.memory_space<vmem>>, vector<1x16x64xbf16>
    %20 = vector.shape_cast %19 : vector<1x16x64xbf16> to vector<16x64xbf16>
    %cst_26 = arith.constant dense<0.000000e+00> : vector<9x64xf32>
    %21 = tpu.matmul %18, %20, %cst_26 {dimension_numbers = #tpu.dot_dimension_numbers<[1], [0], [0], [1], [0, 0, 1, 1], [], []>} : vector<9x16xbf16>, vector<16x64xbf16>, vector<9x64xf32> -> vector<9x64xf32>
    %22 = arith.addf %16, %21 : vector<9x64xf32>
    %c0_27 = arith.constant 0 : index
    %c0_28 = arith.constant 0 : index
    %23 = vector.load %arg5[%c0_27, %c0_28] : memref<1x64xf32, #tpu.memory_space<vmem>>, vector<1x64xf32>
    %24 = vector.broadcast %23 : vector<1x64xf32> to vector<9x64xf32>
    %25 = arith.addf %22, %24 : vector<9x64xf32>
    %cst_29 = arith.constant 0.000000e+00 : f32
    %26 = vector.broadcast %cst_29 : f32 to vector<9x64xf32>
    %27 = arith.maximumf %25, %26 : vector<9x64xf32>
    %28 = arith.truncf %27 : vector<9x64xf32> to vector<9x64xbf16>
    %c0_30 = arith.constant 0 : index
    %c0_31 = arith.constant 0 : index
    %c0_32 = arith.constant 0 : index
    %c0_33 = arith.constant 0 : index
    %29 = vector.load %arg6[%c0_30, %c0_31, %c0_32, %c0_33] : memref<1x1x9x64xbf16, #tpu.memory_space<vmem>>, vector<1x1x9x64xbf16>
    %30 = vector.shape_cast %29 : vector<1x1x9x64xbf16> to vector<9x64xbf16>
    %31 = vector.shape_cast %28 : vector<9x64xbf16> to vector<1x1x9x64xbf16>
    tpu.vector_store %arg6[%c0_30, %c0_31, %c0_32, %c0_33], %31 {strides = array<i32>} : memref<1x1x9x64xbf16, #tpu.memory_space<vmem>>, vector<1x1x9x64xbf16>,
    return
  }
  func.func @transform_0(%arg0: i32, %arg1: i32) -> (i32, i32, i32, i32) {
    %c0_i32 = arith.constant 0 : i32
    %c0_i32_0 = arith.constant 0 : i32
    %c0_i32_1 = arith.constant 0 : i32
    return %arg0, %arg1, %c0_i32, %c0_i32_0 : i32, i32, i32, i32
  }
  func.func @transform_1(%arg0: i32, %arg1: i32) -> (i32, i32, i32, i32) {
    %c1_i32 = arith.constant 1 : i32
    %0 = arith.addi %arg1, %c1_i32 : i32
    %c0_i32 = arith.constant 0 : i32
    %c0_i32_0 = arith.constant 0 : i32
    %c0_i32_1 = arith.constant 0 : i32
    return %arg0, %0, %c0_i32, %c0_i32_0 : i32, i32, i32, i32
  }
  func.func @transform_2(%arg0: i32, %arg1: i32) -> (i32, i32, i32) {
    %c0_i32 = arith.constant 0 : i32
    %c0_i32_0 = arith.constant 0 : i32
    %c0_i32_1 = arith.constant 0 : i32
    %c0_i32_2 = arith.constant 0 : i32
    return %c0_i32, %c0_i32_0, %c0_i32_1 : i32, i32, i32
  }
  func.func @transform_3(%arg0: i32, %arg1: i32) -> (i32, i32) {
    %c0_i32 = arith.constant 0 : i32
    %c0_i32_0 = arith.constant 0 : i32
    %c0_i32_1 = arith.constant 0 : i32
    return %c0_i32, %c0_i32_0 : i32, i32
  }
  func.func @transform_4(%arg0: i32, %arg1: i32) -> (i32, i32, i32, i32) {
    %c0_i32 = arith.constant 0 : i32
    %c0_i32_0 = arith.constant 0 : i32
    %c0_i32_1 = arith.constant 0 : i32
    return %arg0, %arg1, %c0_i32, %c0_i32_0 : i32, i32, i32, i32
  }
}

module attributes {stable_mosaic.version = 11 : i64} {
  func.func @_conv2x2_kernel(%arg0: i32, %arg1: i32, %arg2: memref<1x1x18x16xbf16, #tpu.memory_space<vmem>>, %arg3: memref<1x1x18x16xbf16, #tpu.memory_space<vmem>>, %arg4: memref<4x16x64xbf16, #tpu.memory_space<vmem>>, %arg5: memref<1x64xf32, #tpu.memory_space<vmem>>, %arg6: memref<1x1x17x64xbf16, #tpu.memory_space<vmem>>) attributes {dimension_semantics = [#tpu.dimension_semantics<parallel>, #tpu.dimension_semantics<parallel>], iteration_bounds = array<i64: 2, 17>, scalar_prefetch = 0 : i64, scratch_operands = 0 : i64, tpu.core_type = #tpu.core_type<tc>, window_params = [{transform_indices = @transform_0, window_bounds = array<i64: 1, 1, 18, 16>}, {transform_indices = @transform_1, window_bounds = array<i64: 1, 1, 18, 16>}, {pipeline_mode = #tpu.pipeline_mode<synchronous>, transform_indices = @transform_2, window_bounds = array<i64: 4, 16, 64>}, {pipeline_mode = #tpu.pipeline_mode<synchronous>, transform_indices = @transform_3, window_bounds = array<i64: 1, 64>}, {transform_indices = @transform_4, window_bounds = array<i64: 1, 1, 17, 64>}]} {
    %c0 = arith.constant 0 : index
    %c0_0 = arith.constant 0 : index
    %c0_1 = arith.constant 0 : index
    %c0_2 = arith.constant 0 : index
    %0 = vector.load %arg2[%c0, %c0_0, %c0_1, %c0_2] : memref<1x1x18x16xbf16, #tpu.memory_space<vmem>>, vector<1x1x17x16xbf16>
    %1 = vector.shape_cast %0 : vector<1x1x17x16xbf16> to vector<17x16xbf16>
    %c0_3 = arith.constant 0 : index
    %c0_4 = arith.constant 0 : index
    %c0_5 = arith.constant 0 : index
    %2 = vector.load %arg4[%c0_3, %c0_4, %c0_5] : memref<4x16x64xbf16, #tpu.memory_space<vmem>>, vector<1x16x64xbf16>
    %3 = vector.shape_cast %2 : vector<1x16x64xbf16> to vector<16x64xbf16>
    %cst = arith.constant dense<0.000000e+00> : vector<17x64xf32>
    %4 = tpu.matmul %1, %3, %cst {dimension_numbers = #tpu.dot_dimension_numbers<[1], [0], [0], [1], [0, 0, 1, 1], [], []>} : vector<17x16xbf16>, vector<16x64xbf16>, vector<17x64xf32> -> vector<17x64xf32>
    %c0_6 = arith.constant 0 : index
    %c0_7 = arith.constant 0 : index
    %c1 = arith.constant 1 : index
    %c0_8 = arith.constant 0 : index
    %5 = vector.load %arg2[%c0_6, %c0_7, %c1, %c0_8] : memref<1x1x18x16xbf16, #tpu.memory_space<vmem>>, vector<1x1x17x16xbf16>
    %6 = vector.shape_cast %5 : vector<1x1x17x16xbf16> to vector<17x16xbf16>
    %c1_9 = arith.constant 1 : index
    %c0_10 = arith.constant 0 : index
    %c0_11 = arith.constant 0 : index
    %7 = vector.load %arg4[%c1_9, %c0_10, %c0_11] : memref<4x16x64xbf16, #tpu.memory_space<vmem>>, vector<1x16x64xbf16>
    %8 = vector.shape_cast %7 : vector<1x16x64xbf16> to vector<16x64xbf16>
    %cst_12 = arith.constant dense<0.000000e+00> : vector<17x64xf32>
    %9 = tpu.matmul %6, %8, %cst_12 {dimension_numbers = #tpu.dot_dimension_numbers<[1], [0], [0], [1], [0, 0, 1, 1], [], []>} : vector<17x16xbf16>, vector<16x64xbf16>, vector<17x64xf32> -> vector<17x64xf32>
    %10 = arith.addf %4, %9 : vector<17x64xf32>
    %c0_13 = arith.constant 0 : index
    %c0_14 = arith.constant 0 : index
    %c0_15 = arith.constant 0 : index
    %c0_16 = arith.constant 0 : index
    %11 = vector.load %arg3[%c0_13, %c0_14, %c0_15, %c0_16] : memref<1x1x18x16xbf16, #tpu.memory_space<vmem>>, vector<1x1x17x16xbf16>
    %12 = vector.shape_cast %11 : vector<1x1x17x16xbf16> to vector<17x16xbf16>
    %c2 = arith.constant 2 : index
    %c0_17 = arith.constant 0 : index
    %c0_18 = arith.constant 0 : index
    %13 = vector.load %arg4[%c2, %c0_17, %c0_18] : memref<4x16x64xbf16, #tpu.memory_space<vmem>>, vector<1x16x64xbf16>
    %14 = vector.shape_cast %13 : vector<1x16x64xbf16> to vector<16x64xbf16>
    %cst_19 = arith.constant dense<0.000000e+00> : vector<17x64xf32>
    %15 = tpu.matmul %12, %14, %cst_19 {dimension_numbers = #tpu.dot_dimension_numbers<[1], [0], [0], [1], [0, 0, 1, 1], [], []>} : vector<17x16xbf16>, vector<16x64xbf16>, vector<17x64xf32> -> vector<17x64xf32>
    %16 = arith.addf %10, %15 : vector<17x64xf32>
    %c0_20 = arith.constant 0 : index
    %c0_21 = arith.constant 0 : index
    %c1_22 = arith.constant 1 : index
    %c0_23 = arith.constant 0 : index
    %17 = vector.load %arg3[%c0_20, %c0_21, %c1_22, %c0_23] : memref<1x1x18x16xbf16, #tpu.memory_space<vmem>>, vector<1x1x17x16xbf16>
    %18 = vector.shape_cast %17 : vector<1x1x17x16xbf16> to vector<17x16xbf16>
    %c3 = arith.constant 3 : index
    %c0_24 = arith.constant 0 : index
    %c0_25 = arith.constant 0 : index
    %19 = vector.load %arg4[%c3, %c0_24, %c0_25] : memref<4x16x64xbf16, #tpu.memory_space<vmem>>, vector<1x16x64xbf16>
    %20 = vector.shape_cast %19 : vector<1x16x64xbf16> to vector<16x64xbf16>
    %cst_26 = arith.constant dense<0.000000e+00> : vector<17x64xf32>
    %21 = tpu.matmul %18, %20, %cst_26 {dimension_numbers = #tpu.dot_dimension_numbers<[1], [0], [0], [1], [0, 0, 1, 1], [], []>} : vector<17x16xbf16>, vector<16x64xbf16>, vector<17x64xf32> -> vector<17x64xf32>
    %22 = arith.addf %16, %21 : vector<17x64xf32>
    %c0_27 = arith.constant 0 : index
    %c0_28 = arith.constant 0 : index
    %23 = vector.load %arg5[%c0_27, %c0_28] : memref<1x64xf32, #tpu.memory_space<vmem>>, vector<1x64xf32>
    %24 = vector.broadcast %23 : vector<1x64xf32> to vector<17x64xf32>
    %25 = arith.addf %22, %24 : vector<17x64xf32>
    %cst_29 = arith.constant 0.000000e+00 : f32
    %26 = vector.broadcast %cst_29 : f32 to vector<17x64xf32>
    %27 = arith.maximumf %25, %26 : vector<17x64xf32>
    %28 = arith.truncf %27 : vector<17x64xf32> to vector<17x64xbf16>
    %c0_30 = arith.constant 0 : index
    %c0_31 = arith.constant 0 : index
    %c0_32 = arith.constant 0 : index
    %c0_33 = arith.constant 0 : index
    %29 = vector.load %arg6[%c0_30, %c0_31, %c0_32, %c0_33] : memref<1x1x17x64xbf16, #tpu.memory_space<vmem>>, vector<1x1x17x64xbf16>
    %30 = vector.shape_cast %29 : vector<1x1x17x64xbf16> to vector<17x64xbf16>
    %31 = vector.shape_cast %28 : vector<17x64xbf16> to vector<1x1x17x64xbf16>
    tpu.vector_store %arg6[%c0_30, %c0_31, %c0_32, %c0_33], %31 {strides = array<i32>} : memref<1x1x17x64xbf16, #tpu.memory_space<vmem>>, vector<1x1x17x64xbf16>,
    return
  }
  func.func @transform_0(%arg0: i32, %arg1: i32) -> (i32, i32, i32, i32) {
    %c0_i32 = arith.constant 0 : i32
    %c0_i32_0 = arith.constant 0 : i32
    %c0_i32_1 = arith.constant 0 : i32
    return %arg0, %arg1, %c0_i32, %c0_i32_0 : i32, i32, i32, i32
  }
  func.func @transform_1(%arg0: i32, %arg1: i32) -> (i32, i32, i32, i32) {
    %c1_i32 = arith.constant 1 : i32
    %0 = arith.addi %arg1, %c1_i32 : i32
    %c0_i32 = arith.constant 0 : i32
    %c0_i32_0 = arith.constant 0 : i32
    %c0_i32_1 = arith.constant 0 : i32
    return %arg0, %0, %c0_i32, %c0_i32_0 : i32, i32, i32, i32
  }
  func.func @transform_2(%arg0: i32, %arg1: i32) -> (i32, i32, i32) {
    %c0_i32 = arith.constant 0 : i32
    %c0_i32_0 = arith.constant 0 : i32
    %c0_i32_1 = arith.constant 0 : i32
    %c0_i32_2 = arith.constant 0 : i32
    return %c0_i32, %c0_i32_0, %c0_i32_1 : i32, i32, i32
  }
  func.func @transform_3(%arg0: i32, %arg1: i32) -> (i32, i32) {
    %c0_i32 = arith.constant 0 : i32
    %c0_i32_0 = arith.constant 0 : i32
    %c0_i32_1 = arith.constant 0 : i32
    return %c0_i32, %c0_i32_0 : i32, i32
  }
  func.func @transform_4(%arg0: i32, %arg1: i32) -> (i32, i32, i32, i32) {
    %c0_i32 = arith.constant 0 : i32
    %c0_i32_0 = arith.constant 0 : i32
    %c0_i32_1 = arith.constant 0 : i32
    return %arg0, %arg1, %c0_i32, %c0_i32_0 : i32, i32, i32, i32
  }
}

module attributes {stable_mosaic.version = 11 : i64} {
  func.func @_gemm_bias_kernel(%arg0: i32, %arg1: memref<512x16xbf16, #tpu.memory_space<vmem>>, %arg2: memref<16x3xbf16, #tpu.memory_space<vmem>>, %arg3: memref<1x3xf32, #tpu.memory_space<vmem>>, %arg4: memref<512x3xf32, #tpu.memory_space<vmem>>) attributes {dimension_semantics = [#tpu.dimension_semantics<parallel>], iteration_bounds = array<i64: 4>, scalar_prefetch = 0 : i64, scratch_operands = 0 : i64, tpu.core_type = #tpu.core_type<tc>, window_params = [{transform_indices = @transform_0, window_bounds = array<i64: 512, 16>}, {pipeline_mode = #tpu.pipeline_mode<synchronous>, transform_indices = @transform_1, window_bounds = array<i64: 16, 3>}, {pipeline_mode = #tpu.pipeline_mode<synchronous>, transform_indices = @transform_2, window_bounds = array<i64: 1, 3>}, {transform_indices = @transform_3, window_bounds = array<i64: 512, 3>}]} {
    %c0 = arith.constant 0 : index
    %c0_0 = arith.constant 0 : index
    %0 = vector.load %arg1[%c0, %c0_0] : memref<512x16xbf16, #tpu.memory_space<vmem>>, vector<512x16xbf16>
    %c0_1 = arith.constant 0 : index
    %c0_2 = arith.constant 0 : index
    %1 = vector.load %arg2[%c0_1, %c0_2] : memref<16x3xbf16, #tpu.memory_space<vmem>>, vector<16x3xbf16>
    %cst = arith.constant dense<0.000000e+00> : vector<512x3xf32>
    %2 = tpu.matmul %0, %1, %cst {dimension_numbers = #tpu.dot_dimension_numbers<[1], [0], [0], [1], [0, 0, 1, 1], [], []>} : vector<512x16xbf16>, vector<16x3xbf16>, vector<512x3xf32> -> vector<512x3xf32>
    %c0_3 = arith.constant 0 : index
    %c0_4 = arith.constant 0 : index
    %3 = vector.load %arg3[%c0_3, %c0_4] : memref<1x3xf32, #tpu.memory_space<vmem>>, vector<1x3xf32>
    %4 = vector.broadcast %3 : vector<1x3xf32> to vector<512x3xf32>
    %5 = arith.addf %2, %4 : vector<512x3xf32>
    %c0_5 = arith.constant 0 : index
    %c0_6 = arith.constant 0 : index
    %6 = vector.load %arg4[%c0_5, %c0_6] : memref<512x3xf32, #tpu.memory_space<vmem>>, vector<512x3xf32>
    tpu.vector_store %arg4[%c0_5, %c0_6], %5 {strides = array<i32>} : memref<512x3xf32, #tpu.memory_space<vmem>>, vector<512x3xf32>,
    return
  }
  func.func @transform_0(%arg0: i32) -> (i32, i32) {
    %c0_i32 = arith.constant 0 : i32
    %c0_i32_0 = arith.constant 0 : i32
    return %arg0, %c0_i32 : i32, i32
  }
  func.func @transform_1(%arg0: i32) -> (i32, i32) {
    %c0_i32 = arith.constant 0 : i32
    %c0_i32_0 = arith.constant 0 : i32
    %c0_i32_1 = arith.constant 0 : i32
    return %c0_i32, %c0_i32_0 : i32, i32
  }
  func.func @transform_2(%arg0: i32) -> (i32, i32) {
    %c0_i32 = arith.constant 0 : i32
    %c0_i32_0 = arith.constant 0 : i32
    %c0_i32_1 = arith.constant 0 : i32
    return %c0_i32, %c0_i32_0 : i32, i32
  }
  func.func @transform_3(%arg0: i32) -> (i32, i32) {
    %c0_i32 = arith.constant 0 : i32
    %c0_i32_0 = arith.constant 0 : i32
    return %arg0, %c0_i32 : i32, i32
  }
}

</mosaic_0001>

<bundles_post_ra>
// kernel: discrete_vae_forward.8
= control target key start
LH: loop header
LB: loop body
LE: loop exit
PB: predicated region body
PF: predicated region fallthrough
CT: control target
= control target key end

     0   :  { %s741_s15 = smov 0   ;;  %s743_s16 = smov 0   ;;  %s841_s0 = inlined_call_operand.vmem [shape: bf16[2,17,17,12], index: 0, kind: input, shape index: {}, may-alias: {0,1}]   ;;  %s842_s1 = inlined_call_operand.vmem [shape: bf16[2,17,17,12], index: 1, kind: input, shape index: {}, may-alias: {0,1}]   ;;  %s843_s2 = inlined_call_operand.vmem [shape: bf16[4,12,16], index: 2, kind: input, shape index: {}]   ;;  %s844_s3 = inlined_call_operand.vmem [shape: f32[1,16], index: 3, kind: input, shape index: {}]   ;;  %s845_s4 = inlined_call_operand.vmem [shape: bf16[2,16,16,16], index: 4, kind: output, shape index: {}]  }
   0x1   :  { %s745_s17 = smov 0   ;;  %s747_s18 = smov 0  }
   0x2   :  { %s749_s19 = smov 0  }
   0x3 LB: > { %s23_s20 = sadd.s32 1, %s706_s17  ;;  %s26_s21 = sadd.s32 1, %s710_s18  ;;  %s714_s19 = sphi %s749_s19, %s14_s19   ;;  %s710_s18 = sphi %s747_s18, %s849_s18   ;;  %s706_s17 = sphi %s745_s17, %s848_s17   ;;  %s702_s16 = sphi %s743_s16, %s847_s16   ;;  %s698_s15 = sphi %s741_s15, %s846_s15  }
   0x4   : > { %p24_p0 = scmp.ge.s32.totalorder %s23_s20, 16  ;;  %p579_p1 = scmp.ge.s32.totalorder %s714_s19, 1 }
   0x5   : > { %p202_p2 = scmp.lt.s32.totalorder %s714_s19, 33 }
   0x6   : > { %s851_s20 = smov (%p24_p0, %s23_s20), 0  ;;  %s853_s21 = smov (!%p24_p0, %s26_s21), %s710_s18 }
   0x7   : > { %p203_p3 = pnand %p579_p1, %p202_p2  ;;  %p28_p4 = scmp.ge.s32.totalorder %s853_s21, 2 }
   0x8   : > { %p246_p5 = scmp.lt.s32.totalorder (!%p203_p3), %s702_s16, 1  ;;  %s255_s30 = sadd.s32 (!%p203_p3), 1, %s698_s15 }
   0x9   : > { %s855_s21 = smov (%p28_p4, %s853_s21), 0  ;;  %206 = sbr.rel (%p203_p3) target bundleno = 182 (0xb6), region = 36 }
   0xa   : > { %p258_p6 = scmp.lt.s32.totalorder (!%p203_p3), %s255_s30, 16  ;;  %p248_p7 = scmp.lt.s32.totalorder (!%p203_p3), %s698_s15, 16 }
   0xb   : > { %p268_p8 = scmp.lt.s32.totalorder (!%p203_p3), %s698_s15, 15 }
   0xe   : > { %vm314_vm0 = vcmask 1045504   ;;  %v609_v0 = vld [vmem:[%s843_s2 + $0x10] sm:$0xf]  ;;  %v629_v1 = vld [vmem:[%s843_s2 + $0x10] sm:$0x30]  ;;  %s857_s16 = smov (!%p246_p5, %s702_s16), 1 }
   0xf   : > { %v610_v2 = vor.u32 %v629_v1, %v609_v0  ;;  %v598_v3 = vld [vmem:[%s843_s2] sm:$0xf]  ;;  %v626_v4 = vld [vmem:[%s843_s2] sm:$0x30]  ;;  %v593_v6 = vld [vmem:[%s843_s2 + $0x8] sm:$0xf] }
  0x10   : > { %v599_v5 = vor.u32 %v626_v4, %v598_v3  ;;  %v627_v7 = vld [vmem:[%s843_s2 + $0x8] sm:$0x30]  ;;  %v620_v10 = vld [vmem:[%s843_s2 + $0x18] sm:$0xf]  ;;  %s633_s11 = smul.u32 51, %s857_s16  ;;  %s859_s30 = smov (!%p258_p6, %s255_s30), 16 }
  0x11   : > { %v375_v8 = vsel %vm314_vm0, %v610_v2, 0  ;;  %v594_v9 = vor.u32 %v627_v7, %v593_v6  ;;  %v631_v12 = vld [vmem:[%s843_s2 + $0x18] sm:$0x30]  ;;  %s249_s14 = scalar_select %p248_p7, %s698_s15, 16  ;;  %vm310_vm1 = vcmask 97280   ;;  %vm456_vm3 = vcmask 125952  }
  0x12   : > { %384 = vmatpush.bf16.msra.mxu2 %v375_v8  ;;  %v340_v11 = vsel %vm314_vm0, %v599_v5, 0  ;;  %v621_v14 = vor.u32 %v631_v12, %v620_v10  ;;  %s634_s22 = smul.u32 3, %s859_s30  ;;  %vm292_vm2 = vsmask.f32 7424  ;;  %s861_s15 = smov (!%p268_p8, %s698_s15), 15 }
  0x13   : > { %349 = vmatpush.bf16.msra.mxu1 %v340_v11  ;;  %v316_v13 = vsel %vm314_vm0, %v594_v9, 0  ;;  %s632_s23 = smul.u32 3, %s249_s14  ;;  %s582_s30 = sshll.u32 %s861_s15, 1  ;;  %v675_v44 = vld [vmem:[%s844_s3] ss:$0 sm:$0xff] }
  0x14   : > { %325 = vmatpush.bf16.msra.mxu0 %v316_v13  ;;  %v428_v15 = vsel %vm314_vm0, %v621_v14, 0  ;;  %s262_s24 = sadd.s32 %s634_s22, %s633_s11  ;;  %s583_s9 = sshll.u32 %s857_s16, 5 }
  0x15   : > { %437 = vmatpush.bf16.msra.mxu3 %v428_v15  ;;  %s581_s25 = sshll.u32 %s262_s24, 2  ;;  %s252_s26 = sadd.s32 %s633_s11, %s632_s23 }
  0x16   : > { %s264_s29 = scalar_lea.vmem %s842_s1, %s581_s25  ;;  %s580_s5 = sshll.u32 %s252_s26, 2 }
  0x17   : > { %v628_v16 = vld [vmem:[%s264_s29] sm:$0xff]  ;;  %s254_s8 = scalar_lea.vmem %s841_s0, %s580_s5  ;;  %v395_v18 = vld [vmem:[%s264_s29 + $0x8] sm:$0x1]  ;;  %s272_s12 = sadd.s32 %s583_s9, %s582_s30 }
  0x18   : > { %v630_v17 = vld [vmem:[%s264_s29] sm:$0xff]  ;;  %v280_v20 = vld [vmem:[%s254_s8 + $0x8] sm:$0x1]  ;;  %v404_v21 = vunpack.c.l.b16 %v395_v18  ;;  %611 = vmatmul.msk.bf16.vlgmr.msra.gmra.mxu2 %vm310_vm1, %v628_v16  ;;  %s584_s13 = sshll.u32 %s272_s12, 2 }
  0x19   : > { %v625_v19 = vld [vmem:[%s254_s8] sm:$0xff]  ;;  %v289_v22 = vunpack.c.l.b16 %v280_v20  ;;  %v408_v23 = vshrl.u32 %v630_v17, 16  ;;  %v410_v24 = vshll.u32 %v630_v17, 16  ;;  %s274_s23 = scalar_lea.vmem %s845_s4, %s584_s13 }
  0x1a   : > { %v296_v25 = vshll.u32 %v625_v19, 16  ;;  %600 = vmatmul.msk.bf16.vlgmr.msra.gmra.mxu1 %vm310_vm1, %v625_v19  ;;  %v294_v26 = vshrl.u32 %v625_v19, 16  ;;  %v406_v27 = vpack.c.b16 %v404_v21, %v404_v21 }
  0x1b   : > { %v291_v28 = vpack.c.b16 %v289_v22, %v289_v22  ;;  %v412_v29 = vrot.slane %v410_v24, 1 }
  0x1c   : > { %v298_v30 = vrot.slane %v296_v25, 1  ;;  %v415_v31 = vshll.u32 %v406_v27, 16 }
  0x1d   : > { %v301_v32 = vshll.u32 %v291_v28, 16  ;;  %v413_v33 = vor.u32 %v412_v29, %v408_v23 }
  0x1e   : > { %v299_v34 = vor.u32 %v298_v30, %v294_v26  ;;  %v417_v35 = vrot.slane %v415_v31, 1 }
  0x1f   : > { %v303_v36 = vrot.slane %v301_v32, 1 }
  0x20   : > { %v418_v37 = vsel %vm292_vm2, %v413_v33, %v417_v35 }
  0x21   : > { %v304_v38 = vsel %vm292_vm2, %v299_v34, %v303_v36  ;;  %622 = vmatmul.msk.bf16.vlgmr.msra.gmra.mxu3 %vm310_vm1, %v418_v37 }
  0x22   : > { %595 = vmatmul.msk.bf16.vlgmr.msra.gmra.mxu0 %vm310_vm1, %v304_v38 }
  0x97   : > { %v351_v39 = vpop.f32.mrf.mxu1 }
  0x9b   : > { %v386_v42 = vpop.f32.mrf.mxu2 }
  0x9f   : > { %v327_v40 = vpop.f32.mrf.mxu0  ;;  %v353_v47 = vpop.f32.mrf.mxu1 }
  0xa0   : > { %v352_v41 = vadd.f32 %v351_v39, %v327_v40 }
  0xa2   : > { %v391_v43 = vadd.f32 %v386_v42, %v352_v41 }
  0xa3   : > { %v388_v52 = vpop.f32.mrf.mxu2 }
  0xa4   : > { %v439_v45 = vpop.f32.mrf.mxu3 }
  0xa5   : > { %v444_v46 = vadd.f32 %v439_v45, %v391_v43 }
  0xa7   : > { %v450_v48 = vadd.f32 %v675_v44, %v444_v46  ;;  %v329_v49 = vpop.f32.mrf.mxu0 }
  0xa8   : > { %v354_v50 = vadd.f32 %v353_v47, %v329_v49 }
  0xa9   : > { %v452_v51 = vmax.f32 %v450_v48, 0.0 }
  0xaa   : > { %v392_v54 = vadd.f32 %v388_v52, %v354_v50 }
  0xab   : > { %v454_v53 = vpack.c.bf16 %v452_v51, %v452_v51 }
  0xac   : > { %v441_v55 = vpop.f32.mrf.mxu3 }
  0xad   : > { %457 = vst.msk [vmem:[%s274_s23] sm:$0xf] %vm456_vm3, %v454_v53  ;;  %v445_v56 = vadd.f32 %v441_v55, %v392_v54 }
  0xaf   : > { %v451_v57 = vadd.f32 %v675_v44, %v445_v56 }
  0xb1   : > { %v453_v58 = vmax.f32 %v451_v57, 0.0 }
  0xb3   : > { %v455_v59 = vpack.c.bf16 %v453_v58, %v453_v58 }
  0xb5   : > { %458 = vst.msk [vmem:[%s274_s23 + $0x4] sm:$0xf] %vm456_vm3, %v455_v59 }
  0xb6 PF: > { %s14_s19 = sadd.s32 1, %s714_s19   ;;  %s846_s15 = smov %s706_s17 }
  0xb7   : > { %p11_p9 = scmp.ge.s32.totalorder %s14_s19, 34   ;;  %s847_s16 = smov %s710_s18 }
  0xb8   : > { %s848_s17 = smov %s851_s20  ;;  %s849_s18 = smov %s855_s21 }
  0xb9   :  { %13 = sbr.rel (!%p11_p9) target bundleno = 3 (0x3), region = 72 }

// kernel: discrete_vae_forward.9
= control target key start
LH: loop header
LB: loop body
LE: loop exit
PB: predicated region body
PF: predicated region fallthrough
CT: control target
= control target key end

     0   :  { %s858_s15 = smov 0   ;;  %s860_s16 = smov 0   ;;  %s992_s0 = inlined_call_operand.vmem [shape: bf16[2,9,9,64], index: 0, kind: input, shape index: {}, may-alias: {0,1}]   ;;  %s993_s1 = inlined_call_operand.vmem [shape: bf16[2,9,9,64], index: 1, kind: input, shape index: {}, may-alias: {0,1}]   ;;  %s994_s2 = inlined_call_operand.vmem [shape: bf16[4,64,16], index: 2, kind: input, shape index: {}]   ;;  %s995_s3 = inlined_call_operand.vmem [shape: f32[1,16], index: 3, kind: input, shape index: {}]   ;;  %s996_s4 = inlined_call_operand.vmem [shape: bf16[2,8,8,16], index: 4, kind: output, shape index: {}]  }
   0x1   :  { %s862_s17 = smov 0   ;;  %s864_s18 = smov 0  }
   0x2   :  { %s866_s19 = smov 0  }
   0x3 LB: > { %s23_s20 = sadd.s32 1, %s823_s17  ;;  %s26_s21 = sadd.s32 1, %s827_s18  ;;  %s831_s19 = sphi %s866_s19, %s14_s19   ;;  %s827_s18 = sphi %s864_s18, %s1001_s18   ;;  %s823_s17 = sphi %s862_s17, %s1000_s17   ;;  %s819_s16 = sphi %s860_s16, %s999_s16   ;;  %s815_s15 = sphi %s858_s15, %s998_s15  }
   0x4   : > { %p24_p0 = scmp.ge.s32.totalorder %s23_s20, 8  ;;  %p624_p1 = scmp.ge.s32.totalorder %s831_s19, 1 }
   0x5   : > { %p202_p2 = scmp.lt.s32.totalorder %s831_s19, 17 }
   0x6   : > { %s1003_s20 = smov (%p24_p0, %s23_s20), 0  ;;  %s1005_s21 = smov (!%p24_p0, %s26_s21), %s827_s18 }
   0x7   : > { %p203_p3 = pnand %p624_p1, %p202_p2  ;;  %p28_p4 = scmp.ge.s32.totalorder %s1005_s21, 2 }
   0x8   : > { %p245_p5 = scmp.lt.s32.totalorder (!%p203_p3), %s819_s16, 1  ;;  %p247_p6 = scmp.lt.s32.totalorder (!%p203_p3), %s815_s15, 8 }
   0x9   : > { %s1007_s21 = smov (%p28_p4, %s1005_s21), 0  ;;  %206 = sbr.rel (%p203_p3) target bundleno = 175 (0xaf), region = 36 }
   0xa   : > { %s254_s30 = sadd.s32 (!%p203_p3), 1, %s815_s15  ;;  %p267_p8 = scmp.lt.s32.totalorder (!%p203_p3), %s815_s15, 7 }
   0xb   : > { %p930_p7 = scmp.lt.s32.totalorder (!%p203_p3), %s254_s30, 8 }
   0xe   : > { %v741_v0 = vld [vmem:[%s994_s2 + $0x38] sm:$0xff]  ;;  %v740_v4 = vld [vmem:[%s994_s2 + $0x30] sm:$0xff]  ;;  %s1009_s16 = smov (!%p245_p5, %s819_s16), 1  ;;  %v739_v8 = vld [vmem:[%s994_s2 + $0x28] sm:$0xff]  ;;  %s1011_s30 = smov (!%p930_p7, %s254_s30), 8  ;;  %vm329_vm0 = vcmask 523264  }
   0xf   : > { %v736_v1 = vld [vmem:[%s994_s2 + $0x18] sm:$0xff]  ;;  %337 = vmatpush.bf16.msra.mxu0 %v741_v0  ;;  %v735_v5 = vld [vmem:[%s994_s2 + $0x10] sm:$0xff]  ;;  %s248_s13 = scalar_select %p247_p6, %s815_s15, 8  ;;  %v734_v9 = vld [vmem:[%s994_s2 + $0x8] sm:$0xff]  ;;  %vm508_vm1 = vcmask 125952  }
  0x10   : > { %v745_v2 = vld [vmem:[%s994_s2 + $0x58] sm:$0xff]  ;;  %377 = vmatpush.bf16.msra.mxu1 %v736_v1  ;;  %v744_v6 = vld [vmem:[%s994_s2 + $0x50] sm:$0xff]  ;;  %s751_s14 = smul.u32 18, %s1009_s16  ;;  %v743_v10 = vld [vmem:[%s994_s2 + $0x48] sm:$0xff]  ;;  %s627_s29 = sshll.u32 %s1011_s30, 1 }
  0x11   : > { %v750_v3 = vld [vmem:[%s994_s2 + $0x78] sm:$0xff]  ;;  %427 = vmatpush.bf16.msra.mxu2 %v745_v2  ;;  %v749_v7 = vld [vmem:[%s994_s2 + $0x70] sm:$0xff]  ;;  %s625_s22 = sshll.u32 %s248_s13, 1  ;;  %v748_v11 = vld [vmem:[%s994_s2 + $0x68] sm:$0xff]  ;;  %s1013_s15 = smov (!%p267_p8, %s815_s15), 7 }
  0x12   : > { %491 = vmatpush.bf16.msra.mxu3 %v750_v3  ;;  %s251_s27 = sadd.s32 %s751_s14, %s625_s22  ;;  %v738_v14 = vld [vmem:[%s994_s2 + $0x20] sm:$0xff]  ;;  %s261_s5 = sadd.s32 %s751_s14, %s627_s29 }
  0x13   : > { %338 = vmatpush.bf16.msra.mxu0 %v740_v4  ;;  %s626_s8 = sshll.u32 %s251_s27, 2  ;;  %v733_v15 = vld [vmem:[%s994_s2] sm:$0xff]  ;;  %s628_s28 = sshll.u32 %s261_s5, 2 }
  0x14   : > { %378 = vmatpush.bf16.msra.mxu1 %v735_v5  ;;  %s253_s11 = scalar_lea.vmem %s992_s0, %s626_s8  ;;  %v742_v17 = vld [vmem:[%s994_s2 + $0x40] sm:$0xff]  ;;  %s263_s8 = scalar_lea.vmem %s993_s1, %s628_s28 }
  0x15   : > { %428 = vmatpush.bf16.msra.mxu2 %v744_v6  ;;  %v641_v12 = vld [vmem:[%s253_s11] sm:$0xf]  ;;  %v737_v13 = vld [vmem:[%s253_s11] sm:$0x10]  ;;  %s629_s30 = sshll.u32 %s1009_s16, 3 }
  0x16   : > { %492 = vmatpush.bf16.msra.mxu3 %v749_v7  ;;  %v642_v16 = vor.u32 %v737_v13, %v641_v12  ;;  %v747_v18 = vld [vmem:[%s994_s2 + $0x60] sm:$0xff]  ;;  %s270_s10 = sadd.s32 %s629_s30, %s1013_s15 }
  0x17   : > { %339 = vmatpush.bf16.msra.mxu0 %v739_v8  ;;  %v274_v22 = vld [vmem:[%s253_s11] sm:$0xf]  ;;  %v746_v26 = vld [vmem:[%s263_s8] sm:$0x10]  ;;  %s630_s11 = sshll.u32 %s270_s10, 2 }
  0x18   : > { %379 = vmatpush.bf16.msra.mxu1 %v734_v9  ;;  %v299_v19 = vshrl.u32 %v642_v16, 16  ;;  %v301_v20 = vshll.u32 %v642_v16, 16  ;;  %v386_v24 = vld [vmem:[%s263_s8] sm:$0xf]  ;;  %s272_s22 = scalar_lea.vmem %s996_s4, %s630_s11 }
  0x19   : > { %429 = vmatpush.bf16.msra.mxu2 %v743_v10  ;;  %v712_v25 = vld [vmem:[%s263_s8] sm:$0xf] }
  0x1a   : > { %493 = vmatpush.bf16.msra.mxu3 %v748_v11  ;;  %v303_v21 = vrot.slane %v301_v20, 1  ;;  %v713_v27 = vor.u32 %v746_v26, %v712_v25  ;;  %v792_v39 = vld [vmem:[%s995_s3] ss:$0 sm:$0xff] }
  0x1b   : > { %340 = vmatpush.bf16.msra.mxu0 %v738_v14 }
  0x1c   : > { %380 = vmatpush.bf16.msra.mxu1 %v733_v15  ;;  %v304_v23 = vor.u32 %v303_v21, %v299_v19  ;;  %v454_v28 = vshrl.u32 %v713_v27, 16  ;;  %v456_v29 = vshll.u32 %v713_v27, 16 }
  0x1d   : > { %430 = vmatpush.bf16.msra.mxu2 %v742_v17 }
  0x1e   : > { %494 = vmatpush.bf16.msra.mxu3 %v747_v18  ;;  %659 = vmatmul.msk.bf16.vlgmr.msra.gmra.mxu0 %vm329_vm0, %v304_v23  ;;  %v458_v30 = vrot.slane %v456_v29, 1 }
  0x1f   : > { %676 = vmatmul.msk.bf16.vlgmr.msra.gmra.mxu1 %vm329_vm0, %v274_v22 }
  0x20   : > { %701 = vmatmul.msk.bf16.vlgmr.msra.gmra.mxu2 %vm329_vm0, %v386_v24  ;;  %v459_v31 = vor.u32 %v458_v30, %v454_v28 }
  0x22   : > { %730 = vmatmul.msk.bf16.vlgmr.msra.gmra.mxu3 %vm329_vm0, %v459_v31 }
  0x9b   : > { %v342_v33 = vpop.f32.mrf.mxu0 }
  0x9c   : > { %v382_v32 = vpop.f32.mrf.mxu1 }
  0x9d   : > { %v383_v34 = vadd.f32 %v382_v32, %v342_v33 }
  0xa3   : > { %v432_v35 = vpop.f32.mrf.mxu2  ;;  %v344_v37 = vpop.f32.mrf.mxu0 }
  0xa4   : > { %v384_v36 = vpop.f32.mrf.mxu1  ;;  %v436_v38 = vadd.f32 %v432_v35, %v383_v34 }
  0xa5   : > { %v496_v40 = vpop.f32.mrf.mxu3 }
  0xa6   : > { %v500_v41 = vadd.f32 %v496_v40, %v436_v38 }
  0xa8   : > { %v505_v43 = vadd.f32 %v792_v39, %v500_v41 }
  0xaa   : > { %v506_v44 = vmax.f32 %v505_v43, 0.0 }
  0xab   : > { %v434_v42 = vpop.f32.mrf.mxu2 }
  0xac   : > { %v507_v45 = vpack.c.bf16 %v506_v44, %v506_v44 }
  0xad   : > { %v498_v46 = vpop.f32.mrf.mxu3 }
  0xae   : > { %509 = vst.msk [vmem:[%s272_s22] sm:$0xf] %vm508_vm1, %v507_v45 }
  0xaf PF: > { %s14_s19 = sadd.s32 1, %s831_s19   ;;  %s998_s15 = smov %s823_s17 }
  0xb0   : > { %p11_p9 = scmp.ge.s32.totalorder %s14_s19, 18   ;;  %s999_s16 = smov %s827_s18 }
  0xb1   : > { %s1000_s17 = smov %s1003_s20  ;;  %s1001_s18 = smov %s1007_s21 }
  0xb2   :  { %13 = sbr.rel (!%p11_p9) target bundleno = 3 (0x3), region = 72 }

// kernel: discrete_vae_forward.10
= control target key start
LH: loop header
LB: loop body
LE: loop exit
PB: predicated region body
PF: predicated region fallthrough
CT: control target
= control target key end

     0   :  { %s829_s15 = smov 0   ;;  %s831_s16 = smov 0   ;;  %s949_s0 = inlined_call_operand.vmem [shape: bf16[2,5,5,64], index: 0, kind: input, shape index: {}, may-alias: {0,1}]   ;;  %s950_s1 = inlined_call_operand.vmem [shape: bf16[2,5,5,64], index: 1, kind: input, shape index: {}, may-alias: {0,1}]   ;;  %s951_s2 = inlined_call_operand.vmem [shape: bf16[4,64,16], index: 2, kind: input, shape index: {}]   ;;  %s952_s3 = inlined_call_operand.vmem [shape: f32[1,16], index: 3, kind: input, shape index: {}]   ;;  %s953_s4 = inlined_call_operand.vmem [shape: bf16[2,4,4,16], index: 4, kind: output, shape index: {}]  }
   0x1   :  { %s833_s17 = smov 0   ;;  %s835_s18 = smov 0  }
   0x2   :  { %s837_s19 = smov 0  }
   0x3 LB: > { %s23_s20 = sadd.s32 1, %s794_s17  ;;  %s26_s21 = sadd.s32 1, %s798_s18  ;;  %s802_s19 = sphi %s837_s19, %s14_s19   ;;  %s798_s18 = sphi %s835_s18, %s957_s18   ;;  %s794_s17 = sphi %s833_s17, %s956_s17   ;;  %s790_s16 = sphi %s831_s16, %s955_s16   ;;  %s786_s15 = sphi %s829_s15, %s954_s15  }
   0x4   : > { %p24_p0 = scmp.ge.s32.totalorder %s23_s20, 4  ;;  %p607_p1 = scmp.ge.s32.totalorder %s802_s19, 1 }
   0x5   : > { %p200_p2 = scmp.lt.s32.totalorder %s802_s19, 9 }
   0x6   : > { %s959_s20 = smov (%p24_p0, %s23_s20), 0  ;;  %s961_s21 = smov (!%p24_p0, %s26_s21), %s798_s18 }
   0x7   : > { %p201_p3 = pnand %p607_p1, %p200_p2  ;;  %p28_p4 = scmp.ge.s32.totalorder %s961_s21, 2 }
   0x8   : > { %p241_p5 = scmp.lt.s32.totalorder (!%p201_p3), %s790_s16, 1  ;;  %p243_p6 = scmp.lt.s32.totalorder (!%p201_p3), %s786_s15, 4 }
   0x9   : > { %s963_s21 = smov (%p28_p4, %s961_s21), 0  ;;  %204 = sbr.rel (%p201_p3) target bundleno = 177 (0xb1), region = 36 }
   0xa   : > { %s249_s30 = sadd.s32 (!%p201_p3), 1, %s786_s15  ;;  %p261_p8 = scmp.lt.s32.totalorder (!%p201_p3), %s786_s15, 3 }
   0xb   : > { %p252_p7 = scmp.lt.s32.totalorder (!%p201_p3), %s249_s30, 4 }
   0xe   : > { %v709_v0 = vld [vmem:[%s951_s2 + $0x18] sm:$0xff]  ;;  %v708_v4 = vld [vmem:[%s951_s2 + $0x10] sm:$0xff]  ;;  %s965_s16 = smov (!%p241_p5, %s790_s16), 1  ;;  %v707_v8 = vld [vmem:[%s951_s2 + $0x8] sm:$0xff]  ;;  %s967_s30 = smov (!%p252_p7, %s249_s30), 4  ;;  %vm321_vm0 = vcmask 523264  }
   0xf   : > { %v717_v1 = vld [vmem:[%s951_s2 + $0x58] sm:$0xff]  ;;  %369 = vmatpush.bf16.msra.mxu1 %v709_v0  ;;  %v716_v5 = vld [vmem:[%s951_s2 + $0x50] sm:$0xff]  ;;  %s244_s13 = scalar_select %p243_p6, %s786_s15, 4  ;;  %v715_v9 = vld [vmem:[%s951_s2 + $0x48] sm:$0xff]  ;;  %vm497_vm1 = vcmask 123904  }
  0x10   : > { %v713_v2 = vld [vmem:[%s951_s2 + $0x38] sm:$0xff]  ;;  %419 = vmatpush.bf16.msra.mxu2 %v717_v1  ;;  %v712_v6 = vld [vmem:[%s951_s2 + $0x30] sm:$0xff]  ;;  %s722_s14 = smul.u32 5, %s965_s16  ;;  %v711_v10 = vld [vmem:[%s951_s2 + $0x28] sm:$0xff]  ;;  %s969_s15 = smov (!%p261_p8, %s786_s15), 3 }
  0x11   : > { %v721_v3 = vld [vmem:[%s951_s2 + $0x78] sm:$0xff]  ;;  %329 = vmatpush.bf16.msra.mxu0 %v713_v2  ;;  %v720_v7 = vld [vmem:[%s951_s2 + $0x70] sm:$0xff]  ;;  %v719_v11 = vld [vmem:[%s951_s2 + $0x68] sm:$0xff] }
  0x12   : > { %480 = vmatpush.bf16.msra.mxu3 %v721_v3  ;;  %s246_s26 = sadd.s32 %s722_s14, %s244_s13  ;;  %v706_v13 = vld [vmem:[%s951_s2] sm:$0xff] }
  0x13   : > { %370 = vmatpush.bf16.msra.mxu1 %v708_v4  ;;  %s608_s6 = sshll.u32 %s246_s26, 2  ;;  %v714_v14 = vld [vmem:[%s951_s2 + $0x40] sm:$0xff]  ;;  %s255_s26 = sadd.s32 %s722_s14, %s967_s30 }
  0x14   : > { %420 = vmatpush.bf16.msra.mxu2 %v716_v5  ;;  %s248_s9 = scalar_lea.vmem %s949_s0, %s608_s6  ;;  %v710_v16 = vld [vmem:[%s951_s2 + $0x20] sm:$0xff]  ;;  %s609_s27 = sshll.u32 %s255_s26, 2 }
  0x15   : > { %330 = vmatpush.bf16.msra.mxu0 %v712_v6  ;;  %v277_v12 = vld [vmem:[%s248_s9] sm:$0x7]  ;;  %s257_s5 = scalar_lea.vmem %s950_s1, %s609_s27  ;;  %s610_s30 = sshll.u32 %s965_s16, 2 }
  0x16   : > { %481 = vmatpush.bf16.msra.mxu3 %v720_v7  ;;  %v288_v15 = vunpack.c.l.b16 %v277_v12  ;;  %v718_v17 = vld [vmem:[%s951_s2 + $0x60] sm:$0xff]  ;;  %s264_s7 = sadd.s32 %s610_s30, %s969_s15 }
  0x17   : > { %371 = vmatpush.bf16.msra.mxu1 %v707_v8  ;;  %v268_v19 = vld [vmem:[%s248_s9] sm:$0x3]  ;;  %s611_s8 = sshll.u32 %s264_s7, 1 }
  0x18   : > { %421 = vmatpush.bf16.msra.mxu2 %v715_v9  ;;  %v289_v18 = vpack.c.b16 %v288_v15, %v288_v15  ;;  %v378_v20 = vld [vmem:[%s257_s5] sm:$0x3]  ;;  %s266_s11 = scalar_lea.vmem %s953_s4, %s611_s8 }
  0x19   : > { %331 = vmatpush.bf16.msra.mxu0 %v711_v10  ;;  %v429_v21 = vld [vmem:[%s257_s5] sm:$0x7] }
  0x1a   : > { %482 = vmatpush.bf16.msra.mxu3 %v719_v11  ;;  %v291_v22 = vshrl.u32 %v289_v18, 16  ;;  %v293_v23 = vshll.u32 %v289_v18, 16  ;;  %v440_v24 = vunpack.c.l.b16 %v429_v21  ;;  %v763_v39 = vld [vmem:[%s952_s3] ss:$0 sm:$0xff] }
  0x1b   : > { %372 = vmatpush.bf16.msra.mxu1 %v706_v13 }
  0x1c   : > { %422 = vmatpush.bf16.msra.mxu2 %v714_v14  ;;  %v295_v25 = vrot.slane %v293_v23, 1  ;;  %v441_v26 = vpack.c.b16 %v440_v24, %v440_v24 }
  0x1d   : > { %332 = vmatpush.bf16.msra.mxu0 %v710_v16 }
  0x1e   : > { %483 = vmatpush.bf16.msra.mxu3 %v718_v17  ;;  %653 = vmatmul.msk.bf16.vlgmr.msra.gmra.mxu1 %vm321_vm0, %v268_v19  ;;  %v296_v27 = vor.u32 %v295_v25, %v291_v22  ;;  %v443_v28 = vshrl.u32 %v441_v26, 16  ;;  %v445_v29 = vshll.u32 %v441_v26, 16 }
  0x1f   : > { %678 = vmatmul.msk.bf16.vlgmr.msra.gmra.mxu2 %vm321_vm0, %v378_v20 }
  0x20   : > { %636 = vmatmul.msk.bf16.vlgmr.msra.gmra.mxu0 %vm321_vm0, %v296_v27  ;;  %v447_v30 = vrot.slane %v445_v29, 1 }
  0x22   : > { %v448_v31 = vor.u32 %v447_v30, %v443_v28 }
  0x24   : > { %703 = vmatmul.msk.bf16.vlgmr.msra.gmra.mxu3 %vm321_vm0, %v448_v31 }
  0x9b   : > { %v374_v32 = vpop.f32.mrf.mxu1 }
  0x9d   : > { %v334_v33 = vpop.f32.mrf.mxu0 }
  0x9e   : > { %v375_v35 = vadd.f32 %v374_v32, %v334_v33 }
  0xa2   : > { %v424_v34 = vpop.f32.mrf.mxu2 }
  0xa3   : > { %v376_v36 = vpop.f32.mrf.mxu1  ;;  %v428_v37 = vadd.f32 %v424_v34, %v375_v35 }
  0xa5   : > { %v336_v38 = vpop.f32.mrf.mxu0 }
  0xa7   : > { %v485_v40 = vpop.f32.mrf.mxu3 }
  0xa8   : > { %v489_v42 = vadd.f32 %v485_v40, %v428_v37 }
  0xaa   : > { %v426_v41 = vpop.f32.mrf.mxu2  ;;  %v494_v43 = vadd.f32 %v763_v39, %v489_v42 }
  0xac   : > { %v495_v44 = vmax.f32 %v494_v43, 0.0 }
  0xae   : > { %v496_v45 = vpack.c.bf16 %v495_v44, %v495_v44 }
  0xaf   : > { %v487_v46 = vpop.f32.mrf.mxu3 }
  0xb0   : > { %498 = vst.msk [vmem:[%s266_s11] sm:$0x3] %vm497_vm1, %v496_v45 }
  0xb1 PF: > { %s14_s19 = sadd.s32 1, %s802_s19   ;;  %s954_s15 = smov %s794_s17 }
  0xb2   : > { %p11_p9 = scmp.ge.s32.totalorder %s14_s19, 10   ;;  %s955_s16 = smov %s798_s18 }
  0xb3   : > { %s956_s17 = smov %s959_s20  ;;  %s957_s18 = smov %s963_s21 }
  0xb4   :  { %13 = sbr.rel (!%p11_p9) target bundleno = 3 (0x3), region = 72 }

// kernel: tile.18
= control target key start
LH: loop header
LB: loop body
LE: loop exit
PB: predicated region body
PF: predicated region fallthrough
CT: control target
= control target key end

     0   :  { %s22_s0 = inlined_call_operand.vmem [shape: f32[16], index: 0, kind: input, shape index: {}]   ;;  %s23_s1 = inlined_call_operand.vmem [shape: f32[4,16], index: 1, kind: output, shape index: {}]  }
   0x1   :  { %v4_v0 = vld [vmem:[%s22_s0] ss:$0 sm:$0xff] }
   0x2   :  { %5 = vst [vmem:[%s23_s1] sm:$0xf] %v4_v0 }

// kernel: tile.19
= control target key start
LH: loop header
LB: loop body
LE: loop exit
PB: predicated region body
PF: predicated region fallthrough
CT: control target
= control target key end

     0   :  { %s37_s8 = smov 16   ;;  %s38_s9 = smov 32   ;;  %vm7_vm0 = vcmask 130048   ;;  %vm13_vm1 = vcmask 523648   ;;  %vm19_vm2 = vcmask 392448   ;;  %vm25_vm3 = vcmask 261248   ;;  %s55_s0 = inlined_call_operand.vmem [shape: f32[4,16], index: 0, kind: input, shape index: {}]   ;;  %s56_s1 = inlined_call_operand.vmem [shape: f32[1,64], index: 1, kind: output, shape index: {}]  }
   0x1   :  { %v4_v0 = vld [vmem:[%s55_s0] sm:$0xf]  ;;  %s36_s0 = smov 48  }
   0x2   :  { %5 = vst [vmem:[#allocation1] sm:$0xf] %v4_v0 }
   0x9   :  { %v10_v1 = vld [vmem:[#allocation1 + $0x3] sm:$0x1]   ;;  %v22_v2 = vld [vmem:[#allocation1 + $0x1] sm:$0x1]   ;;  %v16_v3 = vld [vmem:[#allocation1 + $0x2] sm:$0x1]  }
   0xa   :  { %11 = vrot.lane.b32.xlu0 %v10_v1, %s36_s0  ;;  %23 = vrot.lane.b32.xlu1 %v22_v2, %s37_s8  ;;  %v6_v4 = vld [vmem:[#allocation1] sm:$0x1]  }
   0xb   :  { %8 = vst.msk [vmem:[#allocation0] sm:$0x1] %vm7_vm0, %v6_v4  }
  0x12   :  { %17 = vrot.lane.b32.xlu0 %v16_v3, %s38_s9 }
  0x7c   :  { %v12_v5 = vpop.permute.xlu0 %11   ;;  %v24_v6 = vpop.permute.xlu1 %23  }
  0x7d   :  { %14 = vst.msk [vmem:[#allocation0] sm:$0x1] %vm13_vm1, %v12_v5  }
  0x84   :  { %v18_v7 = vpop.permute.xlu0 %17  }
  0x85   :  { %20 = vst.msk [vmem:[#allocation0] sm:$0x1] %vm19_vm2, %v18_v7  }
  0x86   :  { %26 = vst.msk [vmem:[#allocation0] sm:$0x1] %vm25_vm3, %v24_v6  }
  0x8d   :  { %v29_v8 = vld [vmem:[#allocation0] sm:$0x1] }
  0x8e   :  { %32 = vst [vmem:[%s56_s1] sm:$0x1] %v29_v8 }

// kernel: discrete_vae_forward.11
= control target key start
LH: loop header
LB: loop body
LE: loop exit
PB: predicated region body
PF: predicated region fallthrough
CT: control target
= control target key end

     0   :  { %vm47_vm0 = vcmask 130048   ;;  %vm164_vm1 = vcmask 257024   ;;  %s297_s1 = inlined_call_operand.vmem [shape: bf16[16,16], index: 1, kind: input, shape index: {}]   ;;  %s298_s0 = inlined_call_operand.vmem [shape: bf16[32,16], index: 0, kind: input, shape index: {}]   ;;  %s299_s2 = inlined_call_operand.vmem [shape: f32[1,16], index: 2, kind: input, shape index: {}]   ;;  %s300_s3 = inlined_call_operand.vmem [shape: f32[32,16], index: 3, kind: input, shape index: {}]   ;;  %s301_s4 = inlined_call_operand.vmem [shape: bf16[16,32], index: 4, kind: input, shape index: {}]   ;;  %s302_s5 = inlined_call_operand.vmem [shape: bf16[32,32], index: 5, kind: output, shape index: {}]  }
   0x1   :  { %v195_v0 = vld [vmem:[%s297_s1] sm:$0xff]  ;;  %v194_v2 = vld [vmem:[%s298_s0 + $0x8] sm:$0xff]  ;;  %v75_v10 = vld [vmem:[%s300_s3 + $0x10] sm:$0xff] }
   0x2   :  { %v193_v1 = vld [vmem:[%s298_s0] sm:$0xff]  ;;  %61 = vmatpush.bf16.msra.mxu0 %v195_v0  ;;  %197 = vmatpush.bf16.msra.mxu2 %v195_v0  ;;  %v74_v13 = vld [vmem:[%s300_s3 + $0x8] sm:$0xff]  ;;  %v76_v20 = vld [vmem:[%s300_s3 + $0x18] sm:$0xff] }
   0x3   :  { %v199_v3 = vld [vmem:[%s299_s2] ss:$0 sm:$0xff] }
   0x4   :  { %v73_v5 = vld [vmem:[%s300_s3] sm:$0xff] }
   0x5   :  { %185 = vmatmul.msk.bf16.vlgmr.msra.gmra.mxu0 %vm47_vm0, %v193_v1  ;;  %186 = vmatmul.msk.bf16.vlgmr.msra.gmra.mxu2 %vm47_vm0, %v194_v2  ;;  %v196_v44 = vld [vmem:[%s301_s4] sm:$0xff] }
   0x6   :  { %148 = vmatpush.bf16.msra.mxu1 %v196_v44  ;;  %198 = vmatpush.bf16.msra.mxu3 %v196_v44 }
  0x82   :  { %v63_v4 = vpop.f32.mrf.mxu0 }
  0x83   :  { %v64_v6 = vadd.f32 %v199_v3, %v63_v4 }
  0x85   :  { %v77_v7 = vadd.f32 %v73_v5, %v64_v6 }
  0x87   :  { %v81_v8 = vsel %vm47_vm0, %v77_v7, -inf }
  0x88   :  { %v68_v9 = vpop.f32.mrf.mxu2  ;;  %82 = vmax.xlane.f32.xlu1 %v81_v8 }
  0x89   :  { %v69_v11 = vadd.f32 %v199_v3, %v68_v9 }
  0x8a   :  { %v65_v12 = vpop.f32.mrf.mxu0 }
  0x8b   :  { %v66_v14 = vadd.f32 %v199_v3, %v65_v12  ;;  %v79_v15 = vadd.f32 %v75_v10, %v69_v11 }
  0x8d   :  { %v87_v16 = vsel %vm47_vm0, %v79_v15, -inf  ;;  %v78_v17 = vadd.f32 %v74_v13, %v66_v14 }
  0x8e   :  { %88 = vmax.xlane.f32.xlu0 %v87_v16 }
  0x8f   :  { %v84_v18 = vsel %vm47_vm0, %v78_v17, -inf }
  0x90   :  { %v70_v19 = vpop.f32.mrf.mxu2  ;;  %85 = vmax.xlane.f32.xlu1 %v84_v18 }
  0x91   :  { %v71_v21 = vadd.f32 %v199_v3, %v70_v19 }
  0x93   :  { %v80_v22 = vadd.f32 %v76_v20, %v71_v21 }
  0x95   :  { %v90_v23 = vsel %vm47_vm0, %v80_v22, -inf }
  0x96   :  { %91 = vmax.xlane.f32.xlu0 %v90_v23 }
  0xfb   :  { %v83_v24 = vpop.xlane.xlu1 %82 }
  0xfc   :  { %v93_v25 = vsub.f32 %v77_v7, %v83_v24 }
  0xfe   :  { %v97_v26 = vmul.f32 1.442695, %v93_v25 }
 0x100   :  { %200 = vpow2.f32 %v97_v26 }
 0x101   :  { %v89_v27 = vpop.xlane.xlu0 %88 }
 0x102   :  { %v95_v28 = vsub.f32 %v79_v15, %v89_v27 }
 0x103   :  { %v86_v29 = vpop.xlane.xlu1 %85 }
 0x104   :  { %v101_v30 = vmul.f32 1.442695, %v95_v28  ;;  %v94_v31 = vsub.f32 %v78_v17, %v86_v29 }
 0x106   :  { %v201_v32 = vpop.eup %200  ;;  %202 = vpow2.f32 %v101_v30  ;;  %v99_v33 = vmul.f32 1.442695, %v94_v31 }
 0x107   :  { %v105_v34 = vsel %vm47_vm0, %v201_v32, 0.0 }
 0x108   :  { %204 = vpow2.f32 %v99_v33  ;;  %106 = vadd.xlane.f32.xlu0 %v105_v34 }
 0x109   :  { %v92_v35 = vpop.xlane.xlu0 %91 }
 0x10a   :  { %v96_v36 = vsub.f32 %v80_v22, %v92_v35 }
 0x10c   :  { %v203_v37 = vpop.eup %202  ;;  %v103_v38 = vmul.f32 1.442695, %v96_v36 }
 0x10d   :  { %v111_v39 = vsel %vm47_vm0, %v203_v37, 0.0 }
 0x10e   :  { %v205_v40 = vpop.eup %204  ;;  %206 = vpow2.f32 %v103_v38  ;;  %112 = vadd.xlane.f32.xlu2 %v111_v39 }
 0x10f   :  { %v108_v41 = vsel %vm47_vm0, %v205_v40, 0.0 }
 0x110   :  { %109 = vadd.xlane.f32.xlu1 %v108_v41 }
 0x114   :  { %v207_v42 = vpop.eup %206 }
 0x115   :  { %v114_v43 = vsel %vm47_vm0, %v207_v42, 0.0 }
 0x116   :  { %115 = vadd.xlane.f32.xlu2 %v114_v43 }
 0x17b   :  { %v107_v45 = vpop.xlane.xlu0 %106 }
 0x17c   :  { %208 = vrcp.f32 %v107_v45 }
 0x181   :  { %v113_v46 = vpop.xlane.xlu2 %112 }
 0x182   :  { %v209_v48 = vpop.eup %208 }
 0x183   :  { %v110_v47 = vpop.xlane.xlu1 %109  ;;  %v121_v51 = vmul.f32 %v209_v48, %v201_v32 }
 0x184   :  { %210 = vrcp.f32 %v110_v47 }
 0x185   :  { %212 = vrcp.f32 %v113_v46 }
 0x189   :  { %v116_v49 = vpop.xlane.xlu2 %115 }
 0x18a   :  { %v211_v50 = vpop.eup %210  ;;  %214 = vrcp.f32 %v116_v49 }
 0x18b   :  { %v122_v52 = vmul.f32 %v211_v50, %v205_v40  ;;  %v213_v54 = vpop.eup %212 }
 0x18c   :  { %v123_v56 = vmul.f32 %v213_v54, %v203_v37 }
 0x18d   :  { %v125_v53 = vpack.c.bf16 %v122_v52, %v121_v51 }
 0x18f   :  { %191 = vmatmul.msk.bf16.vlgmr.msra.gmra.mxu1 %vm47_vm0, %v125_v53 }
 0x190   :  { %v215_v55 = vpop.eup %214 }
 0x191   :  { %v124_v57 = vmul.f32 %v215_v55, %v207_v42 }
 0x193   :  { %v126_v58 = vpack.c.bf16 %v124_v57, %v123_v56 }
 0x195   :  { %192 = vmatmul.msk.bf16.vlgmr.msra.gmra.mxu3 %vm47_vm0, %v126_v58 }
 0x20c   :  { %v150_v59 = vpop.f32.mrf.mxu1 }
 0x20d   :  { %v160_v60 = vpack.c.bf16 %v150_v59, %v150_v59 }
 0x20f   :  { %165 = vst.msk [vmem:[%s302_s5] sm:$0xf] %vm164_vm1, %v160_v60 }
 0x214   :  { %v152_v61 = vpop.f32.mrf.mxu1 }
 0x215   :  { %v161_v62 = vpack.c.bf16 %v152_v61, %v152_v61 }
 0x217   :  { %166 = vst.msk [vmem:[%s302_s5 + $0x4] sm:$0xf] %vm164_vm1, %v161_v62 }
 0x218   :  { %v155_v63 = vpop.f32.mrf.mxu3 }
 0x219   :  { %v162_v0 = vpack.c.bf16 %v155_v63, %v155_v63 }
 0x21b   :  { %167 = vst.msk [vmem:[%s302_s5 + $0x8] sm:$0xf] %vm164_vm1, %v162_v0 }
 0x220   :  { %v157_v1 = vpop.f32.mrf.mxu3 }
 0x221   :  { %v163_v2 = vpack.c.bf16 %v157_v1, %v157_v1 }
 0x223   :  { %168 = vst.msk [vmem:[%s302_s5 + $0xc] sm:$0xf] %vm164_vm1, %v163_v2 }

// kernel: discrete_vae_forward.12
= control target key start
LH: loop header
LB: loop body
LE: loop exit
PB: predicated region body
PF: predicated region fallthrough
CT: control target
= control target key end

     0   :  { %s715_s15 = smov 0   ;;  %s717_s16 = smov 0   ;;  %s811_s0 = inlined_call_operand.vmem [shape: bf16[2,6,6,32], index: 0, kind: input, shape index: {}, may-alias: {0,1}]   ;;  %s812_s1 = inlined_call_operand.vmem [shape: bf16[2,6,6,32], index: 1, kind: input, shape index: {}, may-alias: {0,1}]   ;;  %s813_s2 = inlined_call_operand.vmem [shape: bf16[4,32,64], index: 2, kind: input, shape index: {}]   ;;  %s814_s3 = inlined_call_operand.vmem [shape: f32[1,64], index: 3, kind: input, shape index: {}]   ;;  %s815_s4 = inlined_call_operand.vmem [shape: bf16[2,5,5,64], index: 4, kind: output, shape index: {}]  }
   0x1   :  { %s719_s17 = smov 0   ;;  %s721_s18 = smov 0  }
   0x2   :  { %s723_s19 = smov 0  }
   0x3 LB: > { %s23_s20 = sadd.s32 1, %s680_s17  ;;  %s26_s21 = sadd.s32 1, %s684_s18  ;;  %s688_s19 = sphi %s723_s19, %s14_s19   ;;  %s684_s18 = sphi %s721_s18, %s819_s18   ;;  %s680_s17 = sphi %s719_s17, %s818_s17   ;;  %s676_s16 = sphi %s717_s16, %s817_s16   ;;  %s672_s15 = sphi %s715_s15, %s816_s15  }
   0x4   : > { %p24_p0 = scmp.ge.s32.totalorder %s23_s20, 5  ;;  %p545_p1 = scmp.ge.s32.totalorder %s688_s19, 1 }
   0x5   : > { %p200_p2 = scmp.lt.s32.totalorder %s688_s19, 11 }
   0x6   : > { %s821_s20 = smov (%p24_p0, %s23_s20), 0  ;;  %s823_s21 = smov (!%p24_p0, %s26_s21), %s684_s18 }
   0x7   : > { %p201_p3 = pnand %p545_p1, %p200_p2  ;;  %p28_p4 = scmp.ge.s32.totalorder %s823_s21, 2 }
   0x8   : > { %p241_p5 = scmp.lt.s32.totalorder (!%p201_p3), %s676_s16, 1  ;;  %s249_s26 = sadd.s32 (!%p201_p3), 1, %s672_s15 }
   0x9   : > { %s825_s21 = smov (%p28_p4, %s823_s21), 0  ;;  %204 = sbr.rel (%p201_p3) target bundleno = 173 (0xad), region = 36 }
   0xa   : > { %p252_p6 = scmp.lt.s32.totalorder (!%p201_p3), %s249_s26, 5  ;;  %p243_p7 = scmp.lt.s32.totalorder (!%p201_p3), %s672_s15, 5 }
   0xb   : > { %p261_p8 = scmp.lt.s32.totalorder (!%p201_p3), %s672_s15, 4 }
   0xe   : > { %v604_v0 = vld [vmem:[%s813_s2 + $0x28] sm:$0xff]  ;;  %v602_v2 = vld [vmem:[%s813_s2 + $0x18] sm:$0xff]  ;;  %v603_v4 = vld [vmem:[%s813_s2 + $0x20] sm:$0xff]  ;;  %s827_s16 = smov (!%p241_p5, %s676_s16), 1  ;;  %s829_s26 = smov (!%p252_p6, %s249_s26), 5  ;;  %vm300_vm0 = vcmask 261120  }
   0xf   : > { %v600_v1 = vld [vmem:[%s813_s2 + $0x8] sm:$0xff]  ;;  %v606_v3 = vld [vmem:[%s813_s2 + $0x38] sm:$0xff]  ;;  %372 = vmatpush.bf16.msra.mxu2 %v604_v0  ;;  %v599_v5 = vld [vmem:[%s813_s2] sm:$0xff]  ;;  %310 = vmatpush.bf16.msra.mxu0 %v602_v2  ;;  %s607_s13 = smul.u32 6, %s827_s16  ;;  %vm431_vm1 = vcmask 518144  }
  0x10   : > { %338 = vmatpush.bf16.msra.mxu1 %v600_v1  ;;  %416 = vmatpush.bf16.msra.mxu3 %v606_v3  ;;  %v601_v6 = vld [vmem:[%s813_s2 + $0x10] sm:$0xff]  ;;  %s244_s27 = scalar_select %p243_p7, %s672_s15, 5  ;;  %v649_v30 = vld [vmem:[%s814_s3] ss:$0 sm:$0xff]  ;;  %vm432_vm2 = vsmask.f32 2304 }
  0x11   : > { %v605_v7 = vld [vmem:[%s813_s2 + $0x30] sm:$0xff]  ;;  %s255_s14 = sadd.s32 %s607_s13, %s829_s26  ;;  %s831_s15 = smov (!%p261_p8, %s672_s15), 4  ;;  %vm433_vm3 = vmand %vm431_vm1, %vm432_vm2 }
  0x12   : > { %s547_s22 = sshll.u32 %s255_s14, 2  ;;  %s246_s28 = sadd.s32 %s607_s13, %s244_s27 }
  0x13   : > { %373 = vmatpush.bf16.msra.mxu2 %v603_v4  ;;  %311 = vmatpush.bf16.msra.mxu0 %v601_v6  ;;  %s257_s25 = scalar_lea.vmem %s812_s1, %s547_s22  ;;  %s546_s26 = sshll.u32 %s246_s28, 2 }
  0x14   : > { %339 = vmatpush.bf16.msra.mxu1 %v599_v5  ;;  %417 = vmatpush.bf16.msra.mxu3 %v605_v7  ;;  %v345_v8 = vld [vmem:[%s257_s25] sm:$0x7]  ;;  %s248_s5 = scalar_lea.vmem %s811_s0, %s546_s26  ;;  %s608_s6 = smul.u32 5, %s827_s16 }
  0x15   : > { %v386_v9 = vunpack.c.l.b16 %v345_v8  ;;  %v268_v14 = vld [vmem:[%s248_s5] sm:$0x7] }
  0x16   : > { %583 = vmatmul.msk.bf16.vlgmr.msra.gmra.mxu2 %vm300_vm0, %v345_v8  ;;  %v279_v15 = vunpack.c.l.b16 %v268_v14  ;;  %s264_s7 = sadd.s32 %s608_s6, %s831_s15 }
  0x17   : > { %v387_v10 = vpack.c.b16 %v386_v9, %v386_v9  ;;  %570 = vmatmul.msk.bf16.vlgmr.msra.gmra.mxu1 %vm300_vm0, %v268_v14  ;;  %s548_s10 = sshll.u32 %s264_s7, 2 }
  0x18   : > { %v280_v17 = vpack.c.b16 %v279_v15, %v279_v15  ;;  %s266_s13 = scalar_lea.vmem %s815_s4, %s548_s10 }
  0x19   : > { %v389_v11 = vshrl.u32 %v387_v10, 16  ;;  %v391_v12 = vshll.u32 %v387_v10, 16  ;;  %v434_v36 = vld [vmem:[%s266_s13] sm:$0x7] }
  0x1a   : > { %v282_v18 = vshrl.u32 %v280_v17, 16  ;;  %v284_v19 = vshll.u32 %v280_v17, 16 }
  0x1b   : > { %v393_v13 = vrot.slane %v391_v12, 1 }
  0x1c   : > { %v286_v20 = vrot.slane %v284_v19, 1 }
  0x1d   : > { %v394_v16 = vor.u32 %v393_v13, %v389_v11 }
  0x1e   : > { %v287_v21 = vor.u32 %v286_v20, %v282_v18 }
  0x1f   : > { %596 = vmatmul.msk.bf16.vlgmr.msra.gmra.mxu3 %vm300_vm0, %v394_v16 }
  0x20   : > { %561 = vmatmul.msk.bf16.vlgmr.msra.gmra.mxu0 %vm300_vm0, %v287_v21 }
  0x94   : > { %v341_v23 = vpop.f32.mrf.mxu1 }
  0x99   : > { %v375_v22 = vpop.f32.mrf.mxu2 }
  0x9c   : > { %v343_v25 = vpop.f32.mrf.mxu1 }
  0x9d   : > { %v313_v27 = vpop.f32.mrf.mxu0 }
  0x9e   : > { %v342_v28 = vadd.f32 %v341_v23, %v313_v27 }
  0xa0   : > { %v379_v29 = vadd.f32 %v375_v22, %v342_v28 }
  0xa1   : > { %v377_v24 = vpop.f32.mrf.mxu2 }
  0xa2   : > { %v419_v26 = vpop.f32.mrf.mxu3 }
  0xa3   : > { %v423_v31 = vadd.f32 %v419_v26, %v379_v29 }
  0xa5   : > { %v428_v32 = vadd.f32 %v649_v30, %v423_v31  ;;  %v315_v34 = vpop.f32.mrf.mxu0 }
  0xa7   : > { %v429_v35 = vmax.f32 %v428_v32, 0.0 }
  0xa9   : > { %v430_v37 = vpack.c.bf16 %v429_v35, %v429_v35 }
  0xaa   : > { %v421_v33 = vpop.f32.mrf.mxu3 }
  0xab   : > { %v435_v38 = vsel %vm433_vm3, %v430_v37, %v434_v36 }
  0xac   : > { %436 = vst [vmem:[%s266_s13] sm:$0x7] %v435_v38 }
  0xad PF: > { %s14_s19 = sadd.s32 1, %s688_s19   ;;  %s816_s15 = smov %s680_s17 }
  0xae   : > { %p11_p9 = scmp.ge.s32.totalorder %s14_s19, 12   ;;  %s817_s16 = smov %s684_s18 }
  0xaf   : > { %s818_s17 = smov %s821_s20  ;;  %s819_s18 = smov %s825_s21 }
  0xb0   :  { %13 = sbr.rel (!%p11_p9) target bundleno = 3 (0x3), region = 72 }

// kernel: discrete_vae_forward.13
= control target key start
LH: loop header
LB: loop body
LE: loop exit
PB: predicated region body
PF: predicated region fallthrough
CT: control target
= control target key end

     0   :  { %s705_s15 = smov 0   ;;  %s707_s16 = smov 0   ;;  %s789_s0 = inlined_call_operand.vmem [shape: bf16[2,10,10,16], index: 0, kind: input, shape index: {}, may-alias: {0,1}]   ;;  %s790_s1 = inlined_call_operand.vmem [shape: bf16[2,10,10,16], index: 1, kind: input, shape index: {}, may-alias: {0,1}]   ;;  %s791_s2 = inlined_call_operand.vmem [shape: bf16[4,16,64], index: 2, kind: input, shape index: {}]   ;;  %s792_s3 = inlined_call_operand.vmem [shape: f32[1,64], index: 3, kind: input, shape index: {}]   ;;  %s793_s4 = inlined_call_operand.vmem [shape: bf16[2,9,9,64], index: 4, kind: output, shape index: {}]  }
   0x1   :  { %s709_s17 = smov 0   ;;  %s711_s18 = smov 0  }
   0x2   :  { %s713_s19 = smov 0  }
   0x3 LB: > { %s23_s20 = sadd.s32 1, %s670_s17  ;;  %s26_s21 = sadd.s32 1, %s674_s18  ;;  %s678_s19 = sphi %s713_s19, %s14_s19   ;;  %s674_s18 = sphi %s711_s18, %s797_s18   ;;  %s670_s17 = sphi %s709_s17, %s796_s17   ;;  %s666_s16 = sphi %s707_s16, %s795_s16   ;;  %s662_s15 = sphi %s705_s15, %s794_s15  }
   0x4   : > { %p24_p0 = scmp.ge.s32.totalorder %s23_s20, 9  ;;  %p548_p1 = scmp.ge.s32.totalorder %s678_s19, 1 }
   0x5   : > { %p202_p2 = scmp.lt.s32.totalorder %s678_s19, 19 }
   0x6   : > { %s799_s20 = smov (%p24_p0, %s23_s20), 0  ;;  %s801_s21 = smov (!%p24_p0, %s26_s21), %s674_s18 }
   0x7   : > { %p203_p3 = pnand %p548_p1, %p202_p2  ;;  %p28_p4 = scmp.ge.s32.totalorder %s801_s21, 2 }
   0x8   : > { %p246_p5 = scmp.lt.s32.totalorder (!%p203_p3), %s666_s16, 1  ;;  %p248_p6 = scmp.lt.s32.totalorder (!%p203_p3), %s662_s15, 9 }
   0x9   : > { %s803_s21 = smov (%p28_p4, %s801_s21), 0  ;;  %206 = sbr.rel (%p203_p3) target bundleno = 181 (0xb5), region = 36 }
   0xa   : > { %s255_s28 = sadd.s32 (!%p203_p3), 1, %s662_s15  ;;  %p268_p8 = scmp.lt.s32.totalorder (!%p203_p3), %s662_s15, 8 }
   0xb   : > { %p258_p7 = scmp.lt.s32.totalorder (!%p203_p3), %s255_s28, 9 }
   0xe   : > { %v592_v0 = vld [vmem:[%s791_s2] sm:$0xff]  ;;  %v595_v1 = vld [vmem:[%s791_s2 + $0x10] sm:$0xff]  ;;  %v593_v2 = vld [vmem:[%s791_s2 + $0x8] sm:$0xff]  ;;  %s805_s16 = smov (!%p246_p5, %s666_s16), 1  ;;  %vm301_vm0 = vcmask 130048   ;;  %s807_s28 = smov (!%p258_p7, %s255_s28), 9 }
   0xf   : > { %v596_v3 = vld [vmem:[%s791_s2 + $0x18] sm:$0xff]  ;;  %334 = vmatpush.bf16.msra.mxu1 %v592_v0  ;;  %367 = vmatpush.bf16.msra.mxu2 %v595_v1  ;;  %s249_s5 = scalar_select %p248_p6, %s662_s15, 9  ;;  %v639_v23 = vld [vmem:[%s792_s3] ss:$0 sm:$0xff]  ;;  %vm420_vm1 = vcmask 519168   ;;  %vm422_vm2 = vcmask 516096  }
  0x10   : > { %312 = vmatpush.bf16.msra.mxu0 %v593_v2  ;;  %401 = vmatpush.bf16.msra.mxu3 %v596_v3  ;;  %s597_s6 = smul.u32 20, %s805_s16  ;;  %s551_s13 = sshll.u32 %s807_s28, 1  ;;  %vm423_vm3 = vsmask.f32 256 }
  0x11   : > { %s549_s7 = sshll.u32 %s249_s5, 1  ;;  %s809_s15 = smov (!%p268_p8, %s662_s15), 8  ;;  %vm424_vm4 = vmand %vm422_vm2, %vm423_vm3 }
  0x12   : > { %s252_s8 = sadd.s32 %s597_s6, %s549_s7  ;;  %s262_s14 = sadd.s32 %s597_s6, %s551_s13 }
  0x13   : > { %s550_s9 = sshll.u32 %s252_s8, 2  ;;  %s552_s22 = sshll.u32 %s262_s14, 2 }
  0x14   : > { %s254_s12 = scalar_lea.vmem %s789_s0, %s550_s9  ;;  %s264_s25 = scalar_lea.vmem %s790_s1, %s552_s22 }
  0x15   : > { %v559_v4 = vld [vmem:[%s254_s12] sm:$0xf]  ;;  %v591_v5 = vld [vmem:[%s254_s12] sm:$0x10]  ;;  %s598_s26 = smul.u32 18, %s805_s16  ;;  %s553_s27 = sshll.u32 %s809_s15, 1 }
  0x16   : > { %v560_v6 = vor.u32 %v591_v5, %v559_v4  ;;  %v575_v10 = vld [vmem:[%s264_s25] sm:$0xf]  ;;  %v594_v11 = vld [vmem:[%s264_s25] sm:$0x10] }
  0x17   : > { %v576_v12 = vor.u32 %v594_v11, %v575_v10  ;;  %s272_s30 = sadd.s32 %s598_s26, %s553_s27 }
  0x18   : > { %570 = vmatmul.msk.bf16.vlgmr.msra.gmra.mxu1 %vm301_vm0, %v560_v6  ;;  %v289_v7 = vshrl.u32 %v560_v6, 16  ;;  %v291_v8 = vshll.u32 %v560_v6, 16  ;;  %s554_s5 = sshll.u32 %s272_s30, 2 }
  0x19   : > { %581 = vmatmul.msk.bf16.vlgmr.msra.gmra.mxu2 %vm301_vm0, %v576_v12  ;;  %v379_v14 = vshrl.u32 %v576_v12, 16  ;;  %v381_v15 = vshll.u32 %v576_v12, 16  ;;  %s274_s16 = scalar_lea.vmem %s793_s4, %s554_s5 }
  0x1a   : > { %v293_v9 = vrot.slane %v291_v8, 1  ;;  %v425_v38 = vld [vmem:[%s274_s16 + $0x4] sm:$0x1] }
  0x1b   : > { %v383_v16 = vrot.slane %v381_v15, 1 }
  0x1c   : > { %v294_v13 = vor.u32 %v293_v9, %v289_v7 }
  0x1d   : > { %v384_v17 = vor.u32 %v383_v16, %v379_v14 }
  0x1e   : > { %565 = vmatmul.msk.bf16.vlgmr.msra.gmra.mxu0 %vm301_vm0, %v294_v13 }
  0x1f   : > { %588 = vmatmul.msk.bf16.vlgmr.msra.gmra.mxu3 %vm301_vm0, %v384_v17 }
  0x95   : > { %v336_v19 = vpop.f32.mrf.mxu1 }
  0x9b   : > { %v314_v18 = vpop.f32.mrf.mxu0 }
  0x9c   : > { %v337_v20 = vadd.f32 %v336_v19, %v314_v18  ;;  %v369_v21 = vpop.f32.mrf.mxu2 }
  0x9d   : > { %v338_v27 = vpop.f32.mrf.mxu1 }
  0x9e   : > { %v374_v22 = vadd.f32 %v369_v21, %v337_v20 }
  0xa2   : > { %v403_v24 = vpop.f32.mrf.mxu3 }
  0xa3   : > { %v316_v25 = vpop.f32.mrf.mxu0  ;;  %v408_v26 = vadd.f32 %v403_v24, %v374_v22 }
  0xa4   : > { %v339_v29 = vadd.f32 %v338_v27, %v316_v25  ;;  %v371_v31 = vpop.f32.mrf.mxu2 }
  0xa5   : > { %v414_v28 = vadd.f32 %v639_v23, %v408_v26 }
  0xa6   : > { %v375_v33 = vadd.f32 %v371_v31, %v339_v29 }
  0xa7   : > { %v416_v30 = vmax.f32 %v414_v28, 0.0 }
  0xa9   : > { %v418_v32 = vpack.c.bf16 %v416_v30, %v416_v30 }
  0xaa   : > { %v405_v34 = vpop.f32.mrf.mxu3 }
  0xab   : > { %421 = vst.msk [vmem:[%s274_s16] sm:$0xf] %vm420_vm1, %v418_v32  ;;  %v409_v35 = vadd.f32 %v405_v34, %v375_v33 }
  0xad   : > { %v415_v36 = vadd.f32 %v639_v23, %v409_v35 }
  0xaf   : > { %v417_v37 = vmax.f32 %v415_v36, 0.0 }
  0xb1   : > { %v419_v39 = vpack.c.bf16 %v417_v37, %v417_v37 }
  0xb3   : > { %v426_v40 = vsel %vm424_vm4, %v419_v39, %v425_v38 }
  0xb4   : > { %427 = vst [vmem:[%s274_s16 + $0x4] sm:$0x1] %v426_v40 }
  0xb5 PF: > { %s14_s19 = sadd.s32 1, %s678_s19   ;;  %s794_s15 = smov %s670_s17 }
  0xb6   : > { %p11_p9 = scmp.ge.s32.totalorder %s14_s19, 20   ;;  %s795_s16 = smov %s674_s18 }
  0xb7   : > { %s796_s17 = smov %s799_s20  ;;  %s797_s18 = smov %s803_s21 }
  0xb8   :  { %13 = sbr.rel (!%p11_p9) target bundleno = 3 (0x3), region = 72 }

// kernel: discrete_vae_forward.14
= control target key start
LH: loop header
LB: loop body
LE: loop exit
PB: predicated region body
PF: predicated region fallthrough
CT: control target
= control target key end

     0   :  { %s764_s15 = smov 0   ;;  %s766_s16 = smov 0   ;;  %s854_s0 = inlined_call_operand.vmem [shape: bf16[2,18,18,16], index: 0, kind: input, shape index: {}, may-alias: {0,1}]   ;;  %s855_s1 = inlined_call_operand.vmem [shape: bf16[2,18,18,16], index: 1, kind: input, shape index: {}, may-alias: {0,1}]   ;;  %s856_s2 = inlined_call_operand.vmem [shape: bf16[4,16,64], index: 2, kind: input, shape index: {}]   ;;  %s857_s3 = inlined_call_operand.vmem [shape: f32[1,64], index: 3, kind: input, shape index: {}]   ;;  %s858_s4 = inlined_call_operand.vmem [shape: bf16[2,17,17,64], index: 4, kind: output, shape index: {}]  }
   0x1   :  { %s768_s17 = smov 0   ;;  %s770_s18 = smov 0  }
   0x2   :  { %s772_s19 = smov 0  }
   0x3 LB: > { %s23_s20 = sadd.s32 1, %s729_s17  ;;  %s26_s21 = sadd.s32 1, %s733_s18  ;;  %s737_s19 = sphi %s772_s19, %s14_s19   ;;  %s733_s18 = sphi %s770_s18, %s862_s18   ;;  %s729_s17 = sphi %s768_s17, %s861_s17   ;;  %s725_s16 = sphi %s766_s16, %s860_s16   ;;  %s721_s15 = sphi %s764_s15, %s859_s15  }
   0x4   : > { %p24_p0 = scmp.ge.s32.totalorder %s23_s20, 17  ;;  %p603_p1 = scmp.ge.s32.totalorder %s737_s19, 1 }
   0x5   : > { %p202_p2 = scmp.lt.s32.totalorder %s737_s19, 35 }
   0x6   : > { %s864_s20 = smov (%p24_p0, %s23_s20), 0  ;;  %s866_s21 = smov (!%p24_p0, %s26_s21), %s733_s18 }
   0x7   : > { %p203_p3 = pnand %p603_p1, %p202_p2  ;;  %p28_p4 = scmp.ge.s32.totalorder %s866_s21, 2 }
   0x8   : > { %p246_p5 = scmp.lt.s32.totalorder (!%p203_p3), %s725_s16, 1  ;;  %s255_s26 = sadd.s32 (!%p203_p3), 1, %s721_s15 }
   0x9   : > { %s868_s21 = smov (%p28_p4, %s866_s21), 0  ;;  %206 = sbr.rel (%p203_p3) target bundleno = 190 (0xbe), region = 36 }
   0xa   : > { %p258_p6 = scmp.lt.s32.totalorder (!%p203_p3), %s255_s26, 17  ;;  %p248_p7 = scmp.lt.s32.totalorder (!%p203_p3), %s721_s15, 17 }
   0xb   : > { %p268_p8 = scmp.lt.s32.totalorder (!%p203_p3), %s721_s15, 16 }
   0xe   : > { %v651_v0 = vld [vmem:[%s856_s2 + $0x10] sm:$0xff]  ;;  %v648_v1 = vld [vmem:[%s856_s2] sm:$0xff]  ;;  %v649_v2 = vld [vmem:[%s856_s2 + $0x8] sm:$0xff]  ;;  %s870_s16 = smov (!%p246_p5, %s725_s16), 1  ;;  %s872_s26 = smov (!%p258_p6, %s255_s26), 17  ;;  %vm313_vm0 = vcmask 130048  }
   0xf   : > { %v652_v3 = vld [vmem:[%s856_s2 + $0x18] sm:$0xff]  ;;  %399 = vmatpush.bf16.msra.mxu2 %v651_v0  ;;  %355 = vmatpush.bf16.msra.mxu1 %v648_v1  ;;  %s654_s5 = smul.u32 54, %s870_s16  ;;  %vm292_vm1 = vsmask.f32 7424  ;;  %v698_v36 = vld [vmem:[%s857_s3] ss:$0 sm:$0xff] }
  0x10   : > { %327 = vmatpush.bf16.msra.mxu0 %v649_v2  ;;  %447 = vmatpush.bf16.msra.mxu3 %v652_v3  ;;  %s655_s6 = smul.u32 3, %s872_s26  ;;  %vm474_vm2 = vcmask 519168   ;;  %vm477_vm3 = vcmask 516096   ;;  %vm478_vm4 = vsmask.f32 256 }
  0x11   : > { %s249_s12 = scalar_select %p248_p7, %s721_s15, 17  ;;  %vm479_vm5 = vmand %vm477_vm3, %vm478_vm4 }
  0x12   : > { %s262_s7 = sadd.s32 %s655_s6, %s654_s5  ;;  %s874_s15 = smov (!%p268_p8, %s721_s15), 16 }
  0x13   : > { %s605_s8 = sshll.u32 %s262_s7, 2  ;;  %s653_s13 = smul.u32 3, %s249_s12 }
  0x14   : > { %s264_s11 = scalar_lea.vmem %s855_s1, %s605_s8  ;;  %s657_s26 = smul.u32 51, %s870_s16 }
  0x15   : > { %v650_v4 = vld [vmem:[%s264_s11] sm:$0xff]  ;;  %v368_v5 = vld [vmem:[%s264_s11 + $0x8] sm:$0x1]  ;;  %s252_s14 = sadd.s32 %s654_s5, %s653_s13  ;;  %s656_s27 = smul.u32 3, %s874_s15 }
  0x16   : > { %v377_v6 = vunpack.c.l.b16 %v368_v5  ;;  %635 = vmatmul.msk.bf16.vlgmr.msra.gmra.mxu2 %vm313_vm0, %v650_v4  ;;  %v418_v7 = vshll.u32 %v650_v4, 16  ;;  %v416_v8 = vshrl.u32 %v650_v4, 16  ;;  %s604_s22 = sshll.u32 %s252_s14, 2 }
  0x17   : > { %s254_s25 = scalar_lea.vmem %s854_s0, %s604_s22  ;;  %s272_s30 = sadd.s32 %s657_s26, %s656_s27 }
  0x18   : > { %v379_v9 = vpack.c.b16 %v377_v6, %v377_v6  ;;  %v420_v10 = vrot.slane %v418_v7, 1  ;;  %v647_v13 = vld [vmem:[%s254_s25] sm:$0xff]  ;;  %v278_v14 = vld [vmem:[%s254_s25 + $0x8] sm:$0x1]  ;;  %s606_s5 = sshll.u32 %s272_s30, 2 }
  0x19   : > { %v289_v16 = vunpack.c.l.b16 %v278_v14  ;;  %v296_v17 = vshll.u32 %v647_v13, 16  ;;  %623 = vmatmul.msk.bf16.vlgmr.msra.gmra.mxu1 %vm313_vm0, %v647_v13  ;;  %v294_v18 = vshrl.u32 %v647_v13, 16  ;;  %s274_s15 = scalar_lea.vmem %s858_s4, %s606_s5 }
  0x1a   : > { %v422_v11 = vshll.u32 %v379_v9, 16  ;;  %v421_v12 = vor.u32 %v420_v10, %v416_v8  ;;  %v426_v26 = vshrl.u32 %v379_v9, 16  ;;  %v480_v62 = vld [vmem:[%s274_s15 + $0x8] sm:$0x1] }
  0x1b   : > { %v291_v20 = vpack.c.b16 %v289_v16, %v289_v16  ;;  %v298_v21 = vrot.slane %v296_v17, 1 }
  0x1c   : > { %v424_v15 = vrot.slane %v422_v11, 1 }
  0x1d   : > { %v301_v22 = vshll.u32 %v291_v20, 16  ;;  %v299_v23 = vor.u32 %v298_v21, %v294_v18  ;;  %v305_v27 = vshrl.u32 %v291_v20, 16 }
  0x1e   : > { %v425_v19 = vsel %vm292_vm1, %v421_v12, %v424_v15 }
  0x1f   : > { %643 = vmatmul.msk.bf16.vlgmr.msra.gmra.mxu3 %vm313_vm0, %v425_v19  ;;  %v303_v24 = vrot.slane %v301_v22, 1 }
  0x21   : > { %v304_v25 = vsel %vm292_vm1, %v299_v23, %v303_v24 }
  0x22   : > { %617 = vmatmul.msk.bf16.vlgmr.msra.gmra.mxu0 %vm313_vm0, %v304_v25 }
  0x26   : > { %636 = vmatmul.msk.bf16.gmra.mxu2 %vm313_vm0, %v379_v9 }
  0x29   : > { %624 = vmatmul.msk.bf16.gmra.mxu1 %vm313_vm0, %v291_v20 }
  0x2f   : > { %644 = vmatmul.msk.bf16.gmra.mxu3 %vm313_vm0, %v426_v26 }
  0x32   : > { %618 = vmatmul.msk.bf16.gmra.mxu0 %vm313_vm0, %v305_v27 }
  0x96   : > { %v357_v29 = vpop.f32.mrf.mxu1 }
  0x99   : > { %v401_v28 = vpop.f32.mrf.mxu2 }
  0x9e   : > { %v359_v33 = vpop.f32.mrf.mxu1 }
  0x9f   : > { %v329_v32 = vpop.f32.mrf.mxu0 }
  0xa0   : > { %v358_v34 = vadd.f32 %v357_v29, %v329_v32 }
  0xa1   : > { %v403_v31 = vpop.f32.mrf.mxu2 }
  0xa2   : > { %v449_v30 = vpop.f32.mrf.mxu3  ;;  %v410_v35 = vadd.f32 %v401_v28, %v358_v34 }
  0xa4   : > { %v458_v37 = vadd.f32 %v449_v30, %v410_v35 }
  0xa6   : > { %v465_v38 = vadd.f32 %v698_v36, %v458_v37  ;;  %v362_v42 = vpop.f32.mrf.mxu1 }
  0xa7   : > { %v331_v41 = vpop.f32.mrf.mxu0 }
  0xa8   : > { %v468_v43 = vmax.f32 %v465_v38, 0.0  ;;  %v360_v44 = vadd.f32 %v359_v33, %v331_v41 }
  0xa9   : > { %v406_v40 = vpop.f32.mrf.mxu2 }
  0xaa   : > { %v451_v39 = vpop.f32.mrf.mxu3  ;;  %v471_v45 = vpack.c.bf16 %v468_v43, %v468_v43  ;;  %v411_v46 = vadd.f32 %v403_v31, %v360_v44 }
  0xac   : > { %475 = vst.msk [vmem:[%s274_s15] sm:$0xf] %vm474_vm2, %v471_v45  ;;  %v459_v47 = vadd.f32 %v451_v39, %v411_v46 }
  0xae   : > { %v466_v48 = vadd.f32 %v698_v36, %v459_v47  ;;  %v364_v52 = vpop.f32.mrf.mxu1 }
  0xaf   : > { %v334_v51 = vpop.f32.mrf.mxu0 }
  0xb0   : > { %v469_v53 = vmax.f32 %v466_v48, 0.0  ;;  %v363_v54 = vadd.f32 %v362_v42, %v334_v51 }
  0xb1   : > { %v408_v50 = vpop.f32.mrf.mxu2 }
  0xb2   : > { %v454_v49 = vpop.f32.mrf.mxu3  ;;  %v472_v55 = vpack.c.bf16 %v469_v53, %v469_v53  ;;  %v412_v56 = vadd.f32 %v406_v40, %v363_v54 }
  0xb4   : > { %476 = vst.msk [vmem:[%s274_s15 + $0x4] sm:$0xf] %vm474_vm2, %v472_v55  ;;  %v460_v57 = vadd.f32 %v454_v49, %v412_v56 }
  0xb6   : > { %v467_v58 = vadd.f32 %v698_v36, %v460_v57 }
  0xb7   : > { %v336_v60 = vpop.f32.mrf.mxu0 }
  0xb8   : > { %v470_v61 = vmax.f32 %v467_v58, 0.0 }
  0xba   : > { %v456_v59 = vpop.f32.mrf.mxu3  ;;  %v473_v63 = vpack.c.bf16 %v470_v61, %v470_v61 }
  0xbc   : > { %v481_v0 = vsel %vm479_vm5, %v473_v63, %v480_v62 }
  0xbd   : > { %482 = vst [vmem:[%s274_s15 + $0x8] sm:$0x1] %v481_v0 }
  0xbe PF: > { %s14_s19 = sadd.s32 1, %s737_s19   ;;  %s859_s15 = smov %s729_s17 }
  0xbf   : > { %p11_p9 = scmp.ge.s32.totalorder %s14_s19, 36   ;;  %s860_s16 = smov %s733_s18 }
  0xc0   : > { %s861_s17 = smov %s864_s20  ;;  %s862_s18 = smov %s868_s21 }
  0xc1   :  { %13 = sbr.rel (!%p11_p9) target bundleno = 3 (0x3), region = 72 }

// kernel: discrete_vae_forward.15
= control target key start
LH: loop header
LB: loop body
LE: loop exit
PB: predicated region body
PF: predicated region fallthrough
CT: control target
= control target key end

     0   :  { %s1046_s12 = smov 0   ;;  %s1335_s0 = inlined_call_operand.vmem [shape: bf16[2048,16], index: 0, kind: input, shape index: {}]   ;;  %s1336_s1 = inlined_call_operand.vmem [shape: bf16[16,3], index: 1, kind: input, shape index: {}]   ;;  %s1337_s2 = inlined_call_operand.vmem [shape: f32[1,3], index: 2, kind: input, shape index: {}]   ;;  %s1338_s3 = inlined_call_operand.vmem [shape: f32[2048,3], index: 3, kind: output, shape index: {}]  }
   0x1 LB: > { %s798_s13 = sadd.s32 4294967295, %s1024_s12   ;;  %p802_p0 = scmp.ge.s32.totalorder %s1024_s12, 1  ;;  %s1024_s12 = sphi %s1046_s12, %s13_s12  }
   0x2   : > { %p138_p1 = scmp.lt.s32.totalorder %s1024_s12, 5 }
   0x4   : > { %p139_p2 = pnand %p802_p0, %p138_p1 }
   0x5   : > { %s803_s16 = sshll.u32 (!%p139_p2), %s798_s13, 6 }
   0x6   : > { %142 = sbr.rel (%p139_p2) target bundleno = 273 (0x111), region = 32  ;;  %p163_p3 = scmp.lt.s32.totalorder (!%p139_p2), %s803_s16, 255 }
   0xb   : > { %v1005_v0 = vld [vmem:[%s1336_s1] sm:$0xff]  ;;  %s1340_s16 = smov (!%p163_p3, %s803_s16), 255  ;;  %vm411_vm0 = vcmask 130048   ;;  %vm677_vm1 = vcmask 23552  }
   0xc   : > { %515 = vmatpush.bf16.msra.mxu0 %v1005_v0  ;;  %1006 = vmatpush.bf16.msra.mxu1 %v1005_v0  ;;  %s804_s17 = sshll.u32 %s1340_s16, 2  ;;  %s806_s21 = sshll.u32 %s1340_s16, 3  ;;  %v1133_v33 = vld [vmem:[%s1337_s2] ss:$0 sm:$0xff] }
   0xd   : > { %1007 = vmatpush.bf16.msra.mxu2 %v1005_v0  ;;  %1008 = vmatpush.bf16.msra.mxu3 %v1005_v0  ;;  %s1063_s20 = scalar_lea.vmem %s1335_s0, %s804_s17  ;;  %s1138_s26 = scalar_lea.vmem %s1338_s3, %s806_s21 }
   0xe   : > { %v973_v1 = vld [vmem:[%s1063_s20] sm:$0xff]  ;;  %v974_v5 = vld [vmem:[%s1063_s20 + $0x8] sm:$0xff]  ;;  %v975_v9 = vld [vmem:[%s1063_s20 + $0x10] sm:$0xff] }
   0xf   : > { %v981_v2 = vld [vmem:[%s1063_s20 + $0x40] sm:$0xff]  ;;  %939 = vmatmul.msk.bf16.vlgmr.msra.gmra.mxu0 %vm411_vm0, %v973_v1  ;;  %v982_v6 = vld [vmem:[%s1063_s20 + $0x48] sm:$0xff]  ;;  %v983_v10 = vld [vmem:[%s1063_s20 + $0x50] sm:$0xff] }
  0x10   : > { %v989_v3 = vld [vmem:[%s1063_s20 + $0x80] sm:$0xff]  ;;  %947 = vmatmul.msk.bf16.vlgmr.msra.gmra.mxu1 %vm411_vm0, %v981_v2  ;;  %v990_v7 = vld [vmem:[%s1063_s20 + $0x88] sm:$0xff]  ;;  %v991_v11 = vld [vmem:[%s1063_s20 + $0x90] sm:$0xff] }
  0x11   : > { %v997_v4 = vld [vmem:[%s1063_s20 + $0xc0] sm:$0xff]  ;;  %955 = vmatmul.msk.bf16.vlgmr.msra.gmra.mxu2 %vm411_vm0, %v989_v3  ;;  %v998_v8 = vld [vmem:[%s1063_s20 + $0xc8] sm:$0xff]  ;;  %v999_v12 = vld [vmem:[%s1063_s20 + $0xd0] sm:$0xff] }
  0x12   : > { %963 = vmatmul.msk.bf16.vlgmr.msra.gmra.mxu3 %vm411_vm0, %v997_v4  ;;  %v976_v13 = vld [vmem:[%s1063_s20 + $0x18] sm:$0xff]  ;;  %v977_v17 = vld [vmem:[%s1063_s20 + $0x20] sm:$0xff]  ;;  %v978_v21 = vld [vmem:[%s1063_s20 + $0x28] sm:$0xff] }
  0x13   : > { %v984_v14 = vld [vmem:[%s1063_s20 + $0x58] sm:$0xff]  ;;  %v985_v18 = vld [vmem:[%s1063_s20 + $0x60] sm:$0xff]  ;;  %v986_v22 = vld [vmem:[%s1063_s20 + $0x68] sm:$0xff] }
  0x14   : > { %v992_v15 = vld [vmem:[%s1063_s20 + $0x98] sm:$0xff]  ;;  %v993_v19 = vld [vmem:[%s1063_s20 + $0xa0] sm:$0xff]  ;;  %v994_v23 = vld [vmem:[%s1063_s20 + $0xa8] sm:$0xff] }
  0x15   : > { %v1000_v16 = vld [vmem:[%s1063_s20 + $0xd8] sm:$0xff]  ;;  %v1001_v20 = vld [vmem:[%s1063_s20 + $0xe0] sm:$0xff]  ;;  %v1002_v24 = vld [vmem:[%s1063_s20 + $0xe8] sm:$0xff] }
  0x16   : > { %v979_v25 = vld [vmem:[%s1063_s20 + $0x30] sm:$0xff]  ;;  %v980_v29 = vld [vmem:[%s1063_s20 + $0x38] sm:$0xff] }
  0x17   : > { %v987_v26 = vld [vmem:[%s1063_s20 + $0x70] sm:$0xff]  ;;  %v988_v30 = vld [vmem:[%s1063_s20 + $0x78] sm:$0xff] }
  0x18   : > { %v995_v27 = vld [vmem:[%s1063_s20 + $0xb0] sm:$0xff]  ;;  %v996_v31 = vld [vmem:[%s1063_s20 + $0xb8] sm:$0xff] }
  0x19   : > { %v1003_v28 = vld [vmem:[%s1063_s20 + $0xf0] sm:$0xff]  ;;  %v1004_v32 = vld [vmem:[%s1063_s20 + $0xf8] sm:$0xff] }
  0x1f   : > { %940 = vmatmul.msk.bf16.gmra.mxu0 %vm411_vm0, %v974_v5 }
  0x20   : > { %948 = vmatmul.msk.bf16.gmra.mxu1 %vm411_vm0, %v982_v6 }
  0x21   : > { %956 = vmatmul.msk.bf16.gmra.mxu2 %vm411_vm0, %v990_v7 }
  0x22   : > { %964 = vmatmul.msk.bf16.gmra.mxu3 %vm411_vm0, %v998_v8 }
  0x2f   : > { %941 = vmatmul.msk.bf16.gmra.mxu0 %vm411_vm0, %v975_v9 }
  0x30   : > { %949 = vmatmul.msk.bf16.gmra.mxu1 %vm411_vm0, %v983_v10 }
  0x31   : > { %957 = vmatmul.msk.bf16.gmra.mxu2 %vm411_vm0, %v991_v11 }
  0x32   : > { %965 = vmatmul.msk.bf16.gmra.mxu3 %vm411_vm0, %v999_v12 }
  0x3f   : > { %942 = vmatmul.msk.bf16.gmra.mxu0 %vm411_vm0, %v976_v13 }
  0x40   : > { %950 = vmatmul.msk.bf16.gmra.mxu1 %vm411_vm0, %v984_v14 }
  0x41   : > { %958 = vmatmul.msk.bf16.gmra.mxu2 %vm411_vm0, %v992_v15 }
  0x42   : > { %966 = vmatmul.msk.bf16.gmra.mxu3 %vm411_vm0, %v1000_v16 }
  0x4f   : > { %943 = vmatmul.msk.bf16.gmra.mxu0 %vm411_vm0, %v977_v17 }
  0x50   : > { %951 = vmatmul.msk.bf16.gmra.mxu1 %vm411_vm0, %v985_v18 }
  0x51   : > { %959 = vmatmul.msk.bf16.gmra.mxu2 %vm411_vm0, %v993_v19 }
  0x52   : > { %967 = vmatmul.msk.bf16.gmra.mxu3 %vm411_vm0, %v1001_v20 }
  0x5f   : > { %944 = vmatmul.msk.bf16.gmra.mxu0 %vm411_vm0, %v978_v21 }
  0x60   : > { %952 = vmatmul.msk.bf16.gmra.mxu1 %vm411_vm0, %v986_v22 }
  0x61   : > { %960 = vmatmul.msk.bf16.gmra.mxu2 %vm411_vm0, %v994_v23 }
  0x62   : > { %968 = vmatmul.msk.bf16.gmra.mxu3 %vm411_vm0, %v1002_v24 }
  0x6f   : > { %945 = vmatmul.msk.bf16.gmra.mxu0 %vm411_vm0, %v979_v25 }
  0x70   : > { %953 = vmatmul.msk.bf16.gmra.mxu1 %vm411_vm0, %v987_v26 }
  0x71   : > { %961 = vmatmul.msk.bf16.gmra.mxu2 %vm411_vm0, %v995_v27 }
  0x72   : > { %969 = vmatmul.msk.bf16.gmra.mxu3 %vm411_vm0, %v1003_v28 }
  0x7f   : > { %946 = vmatmul.msk.bf16.gmra.mxu0 %vm411_vm0, %v980_v29 }
  0x80   : > { %954 = vmatmul.msk.bf16.gmra.mxu1 %vm411_vm0, %v988_v30 }
  0x81   : > { %962 = vmatmul.msk.bf16.gmra.mxu2 %vm411_vm0, %v996_v31 }
  0x82   : > { %970 = vmatmul.msk.bf16.gmra.mxu3 %vm411_vm0, %v1004_v32 }
  0x8c   : > { %v517_v34 = vpop.f32.mrf.mxu0 }
  0x8d   : > { %v557_v35 = vpop.f32.mrf.mxu1  ;;  %v518_v36 = vadd.f32 %v1133_v33, %v517_v34 }
  0x8e   : > { %v558_v37 = vadd.f32 %v1133_v33, %v557_v35 }
  0x8f   : > { %678 = vst.msk [vmem:[%s1138_s26] sm:$0xff] %vm677_vm1, %v518_v36 }
  0x90   : > { %694 = vst.msk [vmem:[%s1138_s26 + $0x80] sm:$0xff] %vm677_vm1, %v558_v37 }
  0x94   : > { %v597_v38 = vpop.f32.mrf.mxu2  ;;  %v519_v42 = vpop.f32.mrf.mxu0 }
  0x95   : > { %v637_v39 = vpop.f32.mrf.mxu3  ;;  %v598_v40 = vadd.f32 %v1133_v33, %v597_v38  ;;  %v559_v43 = vpop.f32.mrf.mxu1  ;;  %v520_v44 = vadd.f32 %v1133_v33, %v519_v42 }
  0x96   : > { %v638_v41 = vadd.f32 %v1133_v33, %v637_v39  ;;  %v560_v45 = vadd.f32 %v1133_v33, %v559_v43 }
  0x97   : > { %710 = vst.msk [vmem:[%s1138_s26 + $0x100] sm:$0xff] %vm677_vm1, %v598_v40 }
  0x98   : > { %726 = vst.msk [vmem:[%s1138_s26 + $0x180] sm:$0xff] %vm677_vm1, %v638_v41 }
  0x99   : > { %679 = vst.msk [vmem:[%s1138_s26 + $0x8] sm:$0xff] %vm677_vm1, %v520_v44 }
  0x9a   : > { %695 = vst.msk [vmem:[%s1138_s26 + $0x88] sm:$0xff] %vm677_vm1, %v560_v45 }
  0x9c   : > { %v599_v46 = vpop.f32.mrf.mxu2  ;;  %v522_v50 = vpop.f32.mrf.mxu0 }
  0x9d   : > { %v639_v47 = vpop.f32.mrf.mxu3  ;;  %v600_v48 = vadd.f32 %v1133_v33, %v599_v46  ;;  %v562_v51 = vpop.f32.mrf.mxu1  ;;  %v523_v52 = vadd.f32 %v1133_v33, %v522_v50 }
  0x9e   : > { %v640_v49 = vadd.f32 %v1133_v33, %v639_v47  ;;  %v563_v53 = vadd.f32 %v1133_v33, %v562_v51 }
  0x9f   : > { %711 = vst.msk [vmem:[%s1138_s26 + $0x108] sm:$0xff] %vm677_vm1, %v600_v48 }
  0xa0   : > { %727 = vst.msk [vmem:[%s1138_s26 + $0x188] sm:$0xff] %vm677_vm1, %v640_v49 }
  0xa1   : > { %680 = vst.msk [vmem:[%s1138_s26 + $0x10] sm:$0xff] %vm677_vm1, %v523_v52 }
  0xa2   : > { %696 = vst.msk [vmem:[%s1138_s26 + $0x90] sm:$0xff] %vm677_vm1, %v563_v53 }
  0xa4   : > { %v602_v54 = vpop.f32.mrf.mxu2  ;;  %v524_v58 = vpop.f32.mrf.mxu0 }
  0xa5   : > { %v642_v55 = vpop.f32.mrf.mxu3  ;;  %v603_v56 = vadd.f32 %v1133_v33, %v602_v54  ;;  %v564_v59 = vpop.f32.mrf.mxu1  ;;  %v525_v60 = vadd.f32 %v1133_v33, %v524_v58 }
  0xa6   : > { %v643_v57 = vadd.f32 %v1133_v33, %v642_v55  ;;  %v565_v61 = vadd.f32 %v1133_v33, %v564_v59 }
  0xa7   : > { %712 = vst.msk [vmem:[%s1138_s26 + $0x110] sm:$0xff] %vm677_vm1, %v603_v56 }
  0xa8   : > { %728 = vst.msk [vmem:[%s1138_s26 + $0x190] sm:$0xff] %vm677_vm1, %v643_v57 }
  0xa9   : > { %681 = vst.msk [vmem:[%s1138_s26 + $0x18] sm:$0xff] %vm677_vm1, %v525_v60 }
  0xaa   : > { %697 = vst.msk [vmem:[%s1138_s26 + $0x98] sm:$0xff] %vm677_vm1, %v565_v61 }
  0xac   : > { %v604_v62 = vpop.f32.mrf.mxu2  ;;  %v527_v2 = vpop.f32.mrf.mxu0 }
  0xad   : > { %v644_v63 = vpop.f32.mrf.mxu3  ;;  %v605_v0 = vadd.f32 %v1133_v33, %v604_v62  ;;  %v567_v3 = vpop.f32.mrf.mxu1  ;;  %v528_v4 = vadd.f32 %v1133_v33, %v527_v2 }
  0xae   : > { %v645_v1 = vadd.f32 %v1133_v33, %v644_v63  ;;  %v568_v5 = vadd.f32 %v1133_v33, %v567_v3 }
  0xaf   : > { %713 = vst.msk [vmem:[%s1138_s26 + $0x118] sm:$0xff] %vm677_vm1, %v605_v0 }
  0xb0   : > { %729 = vst.msk [vmem:[%s1138_s26 + $0x198] sm:$0xff] %vm677_vm1, %v645_v1 }
  0xb1   : > { %682 = vst.msk [vmem:[%s1138_s26 + $0x20] sm:$0xff] %vm677_vm1, %v528_v4 }
  0xb2   : > { %698 = vst.msk [vmem:[%s1138_s26 + $0xa0] sm:$0xff] %vm677_vm1, %v568_v5 }
  0xb4   : > { %v607_v6 = vpop.f32.mrf.mxu2  ;;  %v529_v10 = vpop.f32.mrf.mxu0 }
  0xb5   : > { %v647_v7 = vpop.f32.mrf.mxu3  ;;  %v608_v8 = vadd.f32 %v1133_v33, %v607_v6  ;;  %v569_v11 = vpop.f32.mrf.mxu1  ;;  %v530_v12 = vadd.f32 %v1133_v33, %v529_v10 }
  0xb6   : > { %v648_v9 = vadd.f32 %v1133_v33, %v647_v7  ;;  %v570_v13 = vadd.f32 %v1133_v33, %v569_v11 }
  0xb7   : > { %714 = vst.msk [vmem:[%s1138_s26 + $0x120] sm:$0xff] %vm677_vm1, %v608_v8 }
  0xb8   : > { %730 = vst.msk [vmem:[%s1138_s26 + $0x1a0] sm:$0xff] %vm677_vm1, %v648_v9 }
  0xb9   : > { %683 = vst.msk [vmem:[%s1138_s26 + $0x28] sm:$0xff] %vm677_vm1, %v530_v12 }
  0xba   : > { %699 = vst.msk [vmem:[%s1138_s26 + $0xa8] sm:$0xff] %vm677_vm1, %v570_v13 }
  0xbc   : > { %v609_v14 = vpop.f32.mrf.mxu2  ;;  %v532_v18 = vpop.f32.mrf.mxu0 }
  0xbd   : > { %v649_v15 = vpop.f32.mrf.mxu3  ;;  %v610_v16 = vadd.f32 %v1133_v33, %v609_v14  ;;  %v572_v19 = vpop.f32.mrf.mxu1  ;;  %v533_v20 = vadd.f32 %v1133_v33, %v532_v18 }
  0xbe   : > { %v650_v17 = vadd.f32 %v1133_v33, %v649_v15  ;;  %v573_v21 = vadd.f32 %v1133_v33, %v572_v19 }
  0xbf   : > { %715 = vst.msk [vmem:[%s1138_s26 + $0x128] sm:$0xff] %vm677_vm1, %v610_v16 }
  0xc0   : > { %731 = vst.msk [vmem:[%s1138_s26 + $0x1a8] sm:$0xff] %vm677_vm1, %v650_v17 }
  0xc1   : > { %684 = vst.msk [vmem:[%s1138_s26 + $0x30] sm:$0xff] %vm677_vm1, %v533_v20 }
  0xc2   : > { %700 = vst.msk [vmem:[%s1138_s26 + $0xb0] sm:$0xff] %vm677_vm1, %v573_v21 }
  0xc4   : > { %v612_v22 = vpop.f32.mrf.mxu2  ;;  %v534_v26 = vpop.f32.mrf.mxu0 }
  0xc5   : > { %v652_v23 = vpop.f32.mrf.mxu3  ;;  %v613_v24 = vadd.f32 %v1133_v33, %v612_v22  ;;  %v574_v27 = vpop.f32.mrf.mxu1  ;;  %v535_v28 = vadd.f32 %v1133_v33, %v534_v26 }
  0xc6   : > { %v653_v25 = vadd.f32 %v1133_v33, %v652_v23  ;;  %v575_v29 = vadd.f32 %v1133_v33, %v574_v27 }
  0xc7   : > { %716 = vst.msk [vmem:[%s1138_s26 + $0x130] sm:$0xff] %vm677_vm1, %v613_v24 }
  0xc8   : > { %732 = vst.msk [vmem:[%s1138_s26 + $0x1b0] sm:$0xff] %vm677_vm1, %v653_v25 }
  0xc9   : > { %685 = vst.msk [vmem:[%s1138_s26 + $0x38] sm:$0xff] %vm677_vm1, %v535_v28 }
  0xca   : > { %701 = vst.msk [vmem:[%s1138_s26 + $0xb8] sm:$0xff] %vm677_vm1, %v575_v29 }
  0xcc   : > { %v614_v30 = vpop.f32.mrf.mxu2  ;;  %v537_v35 = vpop.f32.mrf.mxu0 }
  0xcd   : > { %v654_v31 = vpop.f32.mrf.mxu3  ;;  %v615_v32 = vadd.f32 %v1133_v33, %v614_v30  ;;  %v577_v36 = vpop.f32.mrf.mxu1  ;;  %v538_v37 = vadd.f32 %v1133_v33, %v537_v35 }
  0xce   : > { %v655_v34 = vadd.f32 %v1133_v33, %v654_v31  ;;  %v578_v38 = vadd.f32 %v1133_v33, %v577_v36 }
  0xcf   : > { %717 = vst.msk [vmem:[%s1138_s26 + $0x138] sm:$0xff] %vm677_vm1, %v615_v32 }
  0xd0   : > { %733 = vst.msk [vmem:[%s1138_s26 + $0x1b8] sm:$0xff] %vm677_vm1, %v655_v34 }
  0xd1   : > { %686 = vst.msk [vmem:[%s1138_s26 + $0x40] sm:$0xff] %vm677_vm1, %v538_v37 }
  0xd2   : > { %702 = vst.msk [vmem:[%s1138_s26 + $0xc0] sm:$0xff] %vm677_vm1, %v578_v38 }
  0xd4   : > { %v617_v39 = vpop.f32.mrf.mxu2  ;;  %v539_v43 = vpop.f32.mrf.mxu0 }
  0xd5   : > { %v657_v40 = vpop.f32.mrf.mxu3  ;;  %v618_v41 = vadd.f32 %v1133_v33, %v617_v39  ;;  %v579_v44 = vpop.f32.mrf.mxu1  ;;  %v540_v45 = vadd.f32 %v1133_v33, %v539_v43 }
  0xd6   : > { %v658_v42 = vadd.f32 %v1133_v33, %v657_v40  ;;  %v580_v46 = vadd.f32 %v1133_v33, %v579_v44 }
  0xd7   : > { %718 = vst.msk [vmem:[%s1138_s26 + $0x140] sm:$0xff] %vm677_vm1, %v618_v41 }
  0xd8   : > { %734 = vst.msk [vmem:[%s1138_s26 + $0x1c0] sm:$0xff] %vm677_vm1, %v658_v42 }
  0xd9   : > { %687 = vst.msk [vmem:[%s1138_s26 + $0x48] sm:$0xff] %vm677_vm1, %v540_v45 }
  0xda   : > { %703 = vst.msk [vmem:[%s1138_s26 + $0xc8] sm:$0xff] %vm677_vm1, %v580_v46 }
  0xdc   : > { %v619_v47 = vpop.f32.mrf.mxu2  ;;  %v542_v51 = vpop.f32.mrf.mxu0 }
  0xdd   : > { %v659_v48 = vpop.f32.mrf.mxu3  ;;  %v620_v49 = vadd.f32 %v1133_v33, %v619_v47  ;;  %v582_v52 = vpop.f32.mrf.mxu1  ;;  %v543_v53 = vadd.f32 %v1133_v33, %v542_v51 }
  0xde   : > { %v660_v50 = vadd.f32 %v1133_v33, %v659_v48  ;;  %v583_v54 = vadd.f32 %v1133_v33, %v582_v52 }
  0xdf   : > { %719 = vst.msk [vmem:[%s1138_s26 + $0x148] sm:$0xff] %vm677_vm1, %v620_v49 }
  0xe0   : > { %735 = vst.msk [vmem:[%s1138_s26 + $0x1c8] sm:$0xff] %vm677_vm1, %v660_v50 }
  0xe1   : > { %688 = vst.msk [vmem:[%s1138_s26 + $0x50] sm:$0xff] %vm677_vm1, %v543_v53 }
  0xe2   : > { %704 = vst.msk [vmem:[%s1138_s26 + $0xd0] sm:$0xff] %vm677_vm1, %v583_v54 }
  0xe4   : > { %v622_v55 = vpop.f32.mrf.mxu2  ;;  %v544_v59 = vpop.f32.mrf.mxu0 }
  0xe5   : > { %v662_v56 = vpop.f32.mrf.mxu3  ;;  %v623_v57 = vadd.f32 %v1133_v33, %v622_v55  ;;  %v584_v60 = vpop.f32.mrf.mxu1  ;;  %v545_v61 = vadd.f32 %v1133_v33, %v544_v59 }
  0xe6   : > { %v663_v58 = vadd.f32 %v1133_v33, %v662_v56  ;;  %v585_v62 = vadd.f32 %v1133_v33, %v584_v60 }
  0xe7   : > { %720 = vst.msk [vmem:[%s1138_s26 + $0x150] sm:$0xff] %vm677_vm1, %v623_v57 }
  0xe8   : > { %736 = vst.msk [vmem:[%s1138_s26 + $0x1d0] sm:$0xff] %vm677_vm1, %v663_v58 }
  0xe9   : > { %689 = vst.msk [vmem:[%s1138_s26 + $0x58] sm:$0xff] %vm677_vm1, %v545_v61 }
  0xea   : > { %705 = vst.msk [vmem:[%s1138_s26 + $0xd8] sm:$0xff] %vm677_vm1, %v585_v62 }
  0xec   : > { %v624_v63 = vpop.f32.mrf.mxu2  ;;  %v547_v3 = vpop.f32.mrf.mxu0 }
  0xed   : > { %v664_v0 = vpop.f32.mrf.mxu3  ;;  %v625_v1 = vadd.f32 %v1133_v33, %v624_v63  ;;  %v587_v4 = vpop.f32.mrf.mxu1  ;;  %v548_v5 = vadd.f32 %v1133_v33, %v547_v3 }
  0xee   : > { %v665_v2 = vadd.f32 %v1133_v33, %v664_v0  ;;  %v588_v6 = vadd.f32 %v1133_v33, %v587_v4 }
  0xef   : > { %721 = vst.msk [vmem:[%s1138_s26 + $0x158] sm:$0xff] %vm677_vm1, %v625_v1 }
  0xf0   : > { %737 = vst.msk [vmem:[%s1138_s26 + $0x1d8] sm:$0xff] %vm677_vm1, %v665_v2 }
  0xf1   : > { %690 = vst.msk [vmem:[%s1138_s26 + $0x60] sm:$0xff] %vm677_vm1, %v548_v5 }
  0xf2   : > { %706 = vst.msk [vmem:[%s1138_s26 + $0xe0] sm:$0xff] %vm677_vm1, %v588_v6 }
  0xf4   : > { %v627_v7 = vpop.f32.mrf.mxu2  ;;  %v549_v11 = vpop.f32.mrf.mxu0 }
  0xf5   : > { %v667_v8 = vpop.f32.mrf.mxu3  ;;  %v628_v9 = vadd.f32 %v1133_v33, %v627_v7  ;;  %v589_v12 = vpop.f32.mrf.mxu1  ;;  %v550_v13 = vadd.f32 %v1133_v33, %v549_v11 }
  0xf6   : > { %v668_v10 = vadd.f32 %v1133_v33, %v667_v8  ;;  %v590_v14 = vadd.f32 %v1133_v33, %v589_v12 }
  0xf7   : > { %722 = vst.msk [vmem:[%s1138_s26 + $0x160] sm:$0xff] %vm677_vm1, %v628_v9 }
  0xf8   : > { %738 = vst.msk [vmem:[%s1138_s26 + $0x1e0] sm:$0xff] %vm677_vm1, %v668_v10 }
  0xf9   : > { %691 = vst.msk [vmem:[%s1138_s26 + $0x68] sm:$0xff] %vm677_vm1, %v550_v13 }
  0xfa   : > { %707 = vst.msk [vmem:[%s1138_s26 + $0xe8] sm:$0xff] %vm677_vm1, %v590_v14 }
  0xfc   : > { %v629_v15 = vpop.f32.mrf.mxu2  ;;  %v552_v19 = vpop.f32.mrf.mxu0 }
  0xfd   : > { %v669_v16 = vpop.f32.mrf.mxu3  ;;  %v630_v17 = vadd.f32 %v1133_v33, %v629_v15  ;;  %v592_v20 = vpop.f32.mrf.mxu1  ;;  %v553_v21 = vadd.f32 %v1133_v33, %v552_v19 }
  0xfe   : > { %v670_v18 = vadd.f32 %v1133_v33, %v669_v16  ;;  %v593_v22 = vadd.f32 %v1133_v33, %v592_v20 }
  0xff   : > { %723 = vst.msk [vmem:[%s1138_s26 + $0x168] sm:$0xff] %vm677_vm1, %v630_v17 }
 0x100   : > { %739 = vst.msk [vmem:[%s1138_s26 + $0x1e8] sm:$0xff] %vm677_vm1, %v670_v18 }
 0x101   : > { %692 = vst.msk [vmem:[%s1138_s26 + $0x70] sm:$0xff] %vm677_vm1, %v553_v21 }
 0x102   : > { %708 = vst.msk [vmem:[%s1138_s26 + $0xf0] sm:$0xff] %vm677_vm1, %v593_v22 }
 0x104   : > { %v632_v23 = vpop.f32.mrf.mxu2  ;;  %v554_v27 = vpop.f32.mrf.mxu0 }
 0x105   : > { %v672_v24 = vpop.f32.mrf.mxu3  ;;  %v633_v25 = vadd.f32 %v1133_v33, %v632_v23  ;;  %v594_v28 = vpop.f32.mrf.mxu1  ;;  %v555_v29 = vadd.f32 %v1133_v33, %v554_v27 }
 0x106   : > { %v673_v26 = vadd.f32 %v1133_v33, %v672_v24  ;;  %v595_v30 = vadd.f32 %v1133_v33, %v594_v28 }
 0x107   : > { %724 = vst.msk [vmem:[%s1138_s26 + $0x170] sm:$0xff] %vm677_vm1, %v633_v25 }
 0x108   : > { %740 = vst.msk [vmem:[%s1138_s26 + $0x1f0] sm:$0xff] %vm677_vm1, %v673_v26 }
 0x109   : > { %693 = vst.msk [vmem:[%s1138_s26 + $0x78] sm:$0xff] %vm677_vm1, %v555_v29 }
 0x10a   : > { %709 = vst.msk [vmem:[%s1138_s26 + $0xf8] sm:$0xff] %vm677_vm1, %v595_v30 }
 0x10c   : > { %v634_v31 = vpop.f32.mrf.mxu2 }
 0x10d   : > { %v674_v32 = vpop.f32.mrf.mxu3  ;;  %v635_v34 = vadd.f32 %v1133_v33, %v634_v31 }
 0x10e   : > { %v675_v35 = vadd.f32 %v1133_v33, %v674_v32 }
 0x10f   : > { %725 = vst.msk [vmem:[%s1138_s26 + $0x178] sm:$0xff] %vm677_vm1, %v635_v34 }
 0x110   : > { %741 = vst.msk [vmem:[%s1138_s26 + $0x1f8] sm:$0xff] %vm677_vm1, %v675_v35 }
 0x111 PF: > { %s13_s12 = sadd.s32 1, %s1024_s12  }
 0x112   : > { %p10_p4 = scmp.ge.s32.totalorder %s13_s12, 6  }
 0x114   :  { %12 = sbr.rel (!%p10_p4) target bundleno = 1 (0x1), region = 62 }

</bundles_post_ra>
